<compile_context>
chip_gen: v5e
topology: v5e:2x2
jax: 0.10.0
libtpu: 0.0.40
codegen_flags: <defaults>
</compile_context>

<pallas_src>
import functools

import jax
import jax.numpy as jnp
from jax import lax
from jax.experimental import pallas as pl
from jax.experimental.pallas import tpu as pltpu


def _pick_vmem_limit_bytes():
    """Generation-aware scoped-VMEM limit (v5e/v6e: 128 MiB phys, v7x: 64 MiB)."""
    try:
        cap = int(pltpu.get_tpu_info().vmem_capacity_bytes)
        return min(max(cap - 16 * 1024 * 1024, 32 * 1024 * 1024), 96 * 1024 * 1024)
    except Exception:  # pragma: no cover - conservative fallback
        return 48 * 1024 * 1024


def _conv_stats_kernel(x_ref, w_ref, mask_ref, y_ref, psum_ref, pssq_ref, rhs_ref,
                       *, H, W, Cin_p):
    """Grid point (n, d): conv for one output depth slice + fused BN partial stats.

    x_ref   : (1, D+2, Cin_p, HW + 2*(W+1))  zero-halo padded input, resident per n (VMEM)
    w_ref   : (Cout, 27*Cin_p)               folded, lane-dense tap weights (resident)
    mask_ref: (9, HW)                        in-plane boundary masks, row = (dh+1)*3+(dw+1)
    y_ref   : (1, 1, Cout, HW)               pre-BN conv output slice (lane-dense)
    psum_ref/pssq_ref: (1, Cout, 1)          per-channel stats, accumulated over d
    rhs_ref : (27*Cin_p, HW)                 stacked shifted-input scratch (VMEM)
    """
    d = pl.program_id(1)
    HW = H * W
    Pw = W + 1

    # Hoist the 8 boundary-mask rows (loaded once, reused for all 3 depth taps).
    mrows = {}
    for dh in (-1, 0, 1):
        for dw in (-1, 0, 1):
            if dh == 0 and dw == 0:
                continue
            r0 = (dh + 1) * 3 + (dw + 1)
            mrows[(dh, dw)] = mask_ref[r0:r0 + 1, :]          # (1, HW)

    # Assemble the stacked shifted RHS: rows [t*Cin_p, (t+1)*Cin_p) hold tap t.
    # Depth shift = dynamic index on a major axis; in-plane shift = static lane offset.
    t = 0
    for kd in range(3):                       # input depth = d + kd (padded coords)
        for dh in (-1, 0, 1):
            for dw in (-1, 0, 1):
                off = Pw + dh * W + dw        # static offset into the padded plane
                slab = x_ref[0, d + kd, :, off:off + HW]      # (Cin_p, HW)
                if dh == 0 and dw == 0:
                    rhs_ref[t * Cin_p:(t + 1) * Cin_p, :] = slab
                else:
                    rhs_ref[t * Cin_p:(t + 1) * Cin_p, :] = slab * mrows[(dh, dw)]
                t += 1

    # One MXU contraction over K = 27*Cin_p for the whole depth slice.
    acc = jnp.dot(w_ref[...], rhs_ref[...], preferred_element_type=jnp.float32)
    y_ref[0, 0] = acc                                          # (Cout, HW), lane-dense

    # Fused BN partial statistics, accumulated across the depth axis.
    ps = jnp.sum(acc, axis=1, keepdims=True)
    ss = jnp.sum(acc * acc, axis=1, keepdims=True)

    @pl.when(d == 0)
    def _():
        psum_ref[0] = ps
        pssq_ref[0] = ss

    @pl.when(d > 0)
    def _():
        psum_ref[0] += ps
        pssq_ref[0] += ss


def _bn_lrelu_kernel(y_ref, scale_ref, shift_ref, o_ref, *, G, slope):
    """Apply per-channel BN affine + leaky ReLU and transpose (D,Cout)->(Cout,D) blocks.

    y_ref    : (1, G, Cout, HW)   conv output (depth-major layout from pass 1)
    scale/shift: (Cout, 1)        precomputed BN affine
    o_ref    : (1, Cout, G, HW)   final layout (channel-major), lane-dense stores
    """
    for g in range(G):                         # short static unroll
        z = y_ref[0, g] * scale_ref[...] + shift_ref[...]      # (Cout, HW)
        o_ref[0, :, g, :] = jnp.where(z > 0, z, slope * z)


@functools.partial(jax.jit, static_argnames=("eps", "slope"))
def conv_bn_relu_3d(x, w, gamma, beta, *, eps=1e-5, slope=0.01):
    """x: (N, Cin, D, H, W) f32; w: (Cout, Cin, 3, 3, 3) OIDHW; gamma/beta: (Cout,)."""
    N, Cin, D, H, W = x.shape
    Cout = w.shape[0]
    assert w.shape == (Cout, Cin, 3, 3, 3)

    HW = H * W
    Pw = W + 1                                 # max |in-plane flat offset| of a tap
    Hw_p = HW + 2 * Pw
    Cin_p = ((Cin + 7) // 8) * 8               # full sublane occupancy
    K = 27 * Cin_p

    # ---- layout plumbing (done once, in XLA) ----
    # x -> (N, D+2, Cin_p, HW + 2*Pw): zero depth halo + zero in-plane halo + channel pad.
    x_t = jnp.transpose(x.astype(jnp.float32), (0, 2, 1, 3, 4)).reshape(N, D, Cin, HW)
    x_p = jnp.pad(x_t, ((0, 0), (1, 1), (0, Cin_p - Cin), (Pw, Pw)))

    # weights -> lane-dense folded matrix (Cout, 27*Cin_p), tap order kd*9 + kh*3 + kw.
    w_r = jnp.transpose(w.astype(jnp.float32), (0, 2, 3, 4, 1)).reshape(Cout, 27, Cin)
    w_r = jnp.pad(w_r, ((0, 0), (0, 0), (0, Cin_p - Cin))).reshape(Cout, K)

    # 9-row in-plane boundary-mask table (row = (dh+1)*3 + (dw+1)).
    hh = jnp.arange(H, dtype=jnp.int32).reshape(H, 1)
    ww = jnp.arange(W, dtype=jnp.int32).reshape(1, W)
    rows = []
    for dh in (-1, 0, 1):
        for dw in (-1, 0, 1):
            ok = (hh + dh >= 0) & (hh + dh < H) & (ww + dw >= 0) & (ww + dw < W)
            rows.append(ok.reshape(HW))
    mask9 = jnp.stack(rows, axis=0).astype(jnp.float32)        # (9, HW)

    vmem_limit = _pick_vmem_limit_bytes()

    # ---- pass 1: conv + fused partial BN stats, grid over (batch, depth) ----
    kern1 = functools.partial(_conv_stats_kernel, H=H, W=W, Cin_p=Cin_p)
    y1, psum, pssq = pl.pallas_call(
        kern1,
        grid=(N, D),
        in_specs=[
            pl.BlockSpec((1, D + 2, Cin_p, Hw_p), lambda n, d: (n, 0, 0, 0)),
            pl.BlockSpec((Cout, K), lambda n, d: (0, 0)),
            pl.BlockSpec((9, HW), lambda n, d: (0, 0)),
        ],
        out_specs=[
            pl.BlockSpec((1, 1, Cout, HW), lambda n, d: (n, d, 0, 0)),
            pl.BlockSpec((1, Cout, 1), lambda n, d: (n, 0, 0)),
            pl.BlockSpec((1, Cout, 1), lambda n, d: (n, 0, 0)),
        ],
        out_shape=(
            jax.ShapeDtypeStruct((N, D, Cout, HW), jnp.float32),
            jax.ShapeDtypeStruct((N, Cout, 1), jnp.float32),
            jax.ShapeDtypeStruct((N, Cout, 1), jnp.float32),
        ),
        scratch_shapes=[pltpu.VMEM((K, HW), jnp.float32)],
        compiler_params=pltpu.CompilerParams(
            dimension_semantics=("parallel", "arbitrary"),
            vmem_limit_bytes=vmem_limit),
    )(x_p, w_r, mask9)

    # ---- tiny cross-batch combine: train-mode BatchNorm3d stats (biased variance) ----
    count = float(N * D * HW)
    g32 = gamma.astype(jnp.float32)
    b32 = beta.astype(jnp.float32)
    mean = jnp.sum(psum[:, :, 0], axis=0) / count
    ex2 = jnp.sum(pssq[:, :, 0], axis=0) / count
    var = jnp.maximum(ex2 - mean * mean, 0.0)
    inv_std = lax.rsqrt(var + eps)
    scale = (g32 * inv_std).reshape(Cout, 1)
    shift = (b32 - mean * g32 * inv_std).reshape(Cout, 1)

    # ---- pass 2: BN affine + leaky ReLU + (D,Cout)->(Cout,D) block transpose ----
    G = 8 if D % 8 == 0 else D
    kern2 = functools.partial(_bn_lrelu_kernel, G=G, slope=slope)
    out4 = pl.pallas_call(
        kern2,
        grid=(N, D // G),
        in_specs=[
            pl.BlockSpec((1, G, Cout, HW), lambda n, g: (n, g, 0, 0)),
            pl.BlockSpec((Cout, 1), lambda n, g: (0, 0)),
            pl.BlockSpec((Cout, 1), lambda n, g: (0, 0)),
        ],
        out_specs=pl.BlockSpec((1, Cout, G, HW), lambda n, g: (n, 0, g, 0)),
        out_shape=jax.ShapeDtypeStruct((N, Cout, D, HW), jnp.float32),
        compiler_params=pltpu.CompilerParams(
            dimension_semantics=("parallel", "parallel"),
            vmem_limit_bytes=vmem_limit),
    )(y1, scale, shift)

    return out4.reshape(N, Cout, D, H, W)


def conv_bn_relu_3d_reference(x, w, gamma, beta, eps=1e-5, slope=0.01):
    """Pure-JAX reference matching PyTorch ConvBnReLU3D (train-mode BN, leaky_relu 0.01)."""
    out = lax.conv_general_dilated(
        x, w, window_strides=(1, 1, 1),
        padding=((1, 1), (1, 1), (1, 1)),
        dimension_numbers=("NCDHW", "OIDHW", "NCDHW"),
        precision=lax.Precision.HIGHEST)
    mean = jnp.mean(out, axis=(0, 2, 3, 4), keepdims=True)
    var = jnp.mean((out - mean) ** 2, axis=(0, 2, 3, 4), keepdims=True)
    out = ((out - mean) * lax.rsqrt(var + eps)
           * gamma.reshape(1, -1, 1, 1, 1) + beta.reshape(1, -1, 1, 1, 1))
    return jnp.where(out > 0, out, slope * out)


if __name__ == "__main__":
    N, Cin, Cout, D, H, W = 2, 4, 8, 8, 16, 16
    key = jax.random.PRNGKey(0)
    kx, kw, kg, kb = jax.random.split(key, 4)

    x = jax.random.normal(kx, (N, Cin, D, H, W), dtype=jnp.float32)
    w = 0.1 * jax.random.normal(kw, (Cout, Cin, 3, 3, 3), dtype=jnp.float32)
    gamma = 1.0 + 0.1 * jax.random.normal(kg, (Cout,), dtype=jnp.float32)
    beta = 0.1 * jax.random.normal(kb, (Cout,), dtype=jnp.float32)

    out = jax.block_until_ready(conv_bn_relu_3d(x, w, gamma, beta))
    ref = conv_bn_relu_3d_reference(x, w, gamma, beta)

    assert out.shape == (N, Cout, D, H, W)
    max_err = float(jnp.max(jnp.abs(out - ref)))
    assert jnp.allclose(out, ref, rtol=1e-4, atol=1e-4), f"mismatch vs reference, max abs err={max_err}"

    print("KERNEL_OK")
</pallas_src>

<mosaic_0001>
module attributes {stable_mosaic.version = 11 : i64} {
  func.func @_conv_stats_kernel(%arg0: i32, %arg1: i32, %arg2: memref<1x10x8x290xf32, #tpu.memory_space<vmem>>, %arg3: memref<8x216xf32, #tpu.memory_space<vmem>>, %arg4: memref<9x256xf32, #tpu.memory_space<vmem>>, %arg5: memref<1x1x8x256xf32, #tpu.memory_space<vmem>>, %arg6: memref<1x8x1xf32, #tpu.memory_space<vmem>>, %arg7: memref<1x8x1xf32, #tpu.memory_space<vmem>>, %arg8: memref<216x256xf32, #tpu.memory_space<vmem>>) attributes {dimension_semantics = [#tpu.dimension_semantics<parallel>, #tpu.dimension_semantics<arbitrary>], iteration_bounds = array<i64: 2, 8>, scalar_prefetch = 0 : i64, scratch_operands = 1 : i64, tpu.core_type = #tpu.core_type<tc>, window_params = [{transform_indices = @transform_0, window_bounds = array<i64: 1, 10, 8, 290>}, {pipeline_mode = #tpu.pipeline_mode<synchronous>, transform_indices = @transform_1, window_bounds = array<i64: 8, 216>}, {pipeline_mode = #tpu.pipeline_mode<synchronous>, transform_indices = @transform_2, window_bounds = array<i64: 9, 256>}, {transform_indices = @transform_3, window_bounds = array<i64: 1, 1, 8, 256>}, {transform_indices = @transform_4, window_bounds = array<i64: 1, 8, 1>}, {transform_indices = @transform_5, window_bounds = array<i64: 1, 8, 1>}]} {
    %c0 = arith.constant 0 : index
    %c0_0 = arith.constant 0 : index
    %0 = vector.load %arg4[%c0, %c0_0] : memref<9x256xf32, #tpu.memory_space<vmem>>, vector<1x256xf32>
    %c1 = arith.constant 1 : index
    %c0_1 = arith.constant 0 : index
    %1 = vector.load %arg4[%c1, %c0_1] : memref<9x256xf32, #tpu.memory_space<vmem>>, vector<1x256xf32>
    %c2 = arith.constant 2 : index
    %c0_2 = arith.constant 0 : index
    %2 = vector.load %arg4[%c2, %c0_2] : memref<9x256xf32, #tpu.memory_space<vmem>>, vector<1x256xf32>
    %c3 = arith.constant 3 : index
    %c0_3 = arith.constant 0 : index
    %3 = vector.load %arg4[%c3, %c0_3] : memref<9x256xf32, #tpu.memory_space<vmem>>, vector<1x256xf32>
    %c5 = arith.constant 5 : index
    %c0_4 = arith.constant 0 : index
    %4 = vector.load %arg4[%c5, %c0_4] : memref<9x256xf32, #tpu.memory_space<vmem>>, vector<1x256xf32>
    %c6 = arith.constant 6 : index
    %c0_5 = arith.constant 0 : index
    %5 = vector.load %arg4[%c6, %c0_5] : memref<9x256xf32, #tpu.memory_space<vmem>>, vector<1x256xf32>
    %c7 = arith.constant 7 : index
    %c0_6 = arith.constant 0 : index
    %6 = vector.load %arg4[%c7, %c0_6] : memref<9x256xf32, #tpu.memory_space<vmem>>, vector<1x256xf32>
    %c8 = arith.constant 8 : index
    %c0_7 = arith.constant 0 : index
    %7 = vector.load %arg4[%c8, %c0_7] : memref<9x256xf32, #tpu.memory_space<vmem>>, vector<1x256xf32>
    %c0_i32 = arith.constant 0 : i32
    %8 = arith.addi %arg1, %c0_i32 : i32
    %c0_8 = arith.constant 0 : index
    %9 = arith.index_cast %8 : i32 to index
    %c0_9 = arith.constant 0 : index
    %c0_10 = arith.constant 0 : index
    %10 = vector.load %arg2[%c0_8, %9, %c0_9, %c0_10] : memref<1x10x8x290xf32, #tpu.memory_space<vmem>>, vector<1x1x8x256xf32>
    %11 = vector.shape_cast %10 : vector<1x1x8x256xf32> to vector<8x256xf32>
    %12 = vector.broadcast %0 : vector<1x256xf32> to vector<8x256xf32>
    %13 = arith.mulf %11, %12 : vector<8x256xf32>
    %c0_11 = arith.constant 0 : index
    %c0_12 = arith.constant 0 : index
    %14 = vector.load %arg8[%c0_11, %c0_12] : memref<216x256xf32, #tpu.memory_space<vmem>>, vector<8x256xf32>
    tpu.vector_store %arg8[%c0_11, %c0_12], %13 {strides = array<i32>} : memref<216x256xf32, #tpu.memory_space<vmem>>, vector<8x256xf32>,
    %c0_i32_13 = arith.constant 0 : i32
    %15 = arith.addi %arg1, %c0_i32_13 : i32
    %c0_14 = arith.constant 0 : index
    %16 = arith.index_cast %15 : i32 to index
    %c0_15 = arith.constant 0 : index
    %c1_16 = arith.constant 1 : index
    %17 = vector.load %arg2[%c0_14, %16, %c0_15, %c1_16] : memref<1x10x8x290xf32, #tpu.memory_space<vmem>>, vector<1x1x8x256xf32>
    %18 = vector.shape_cast %17 : vector<1x1x8x256xf32> to vector<8x256xf32>
    %19 = vector.broadcast %1 : vector<1x256xf32> to vector<8x256xf32>
    %20 = arith.mulf %18, %19 : vector<8x256xf32>
    %c8_17 = arith.constant 8 : index
    %c0_18 = arith.constant 0 : index
    %21 = vector.load %arg8[%c8_17, %c0_18] : memref<216x256xf32, #tpu.memory_space<vmem>>, vector<8x256xf32>
    tpu.vector_store %arg8[%c8_17, %c0_18], %20 {strides = array<i32>} : memref<216x256xf32, #tpu.memory_space<vmem>>, vector<8x256xf32>,
    %c0_i32_19 = arith.constant 0 : i32
    %22 = arith.addi %arg1, %c0_i32_19 : i32
    %c0_20 = arith.constant 0 : index
    %23 = arith.index_cast %22 : i32 to index
    %c0_21 = arith.constant 0 : index
    %c2_22 = arith.constant 2 : index
    %24 = vector.load %arg2[%c0_20, %23, %c0_21, %c2_22] : memref<1x10x8x290xf32, #tpu.memory_space<vmem>>, vector<1x1x8x256xf32>
    %25 = vector.shape_cast %24 : vector<1x1x8x256xf32> to vector<8x256xf32>
    %26 = vector.broadcast %2 : vector<1x256xf32> to vector<8x256xf32>
    %27 = arith.mulf %25, %26 : vector<8x256xf32>
    %c16 = arith.constant 16 : index
    %c0_23 = arith.constant 0 : index
    %28 = vector.load %arg8[%c16, %c0_23] : memref<216x256xf32, #tpu.memory_space<vmem>>, vector<8x256xf32>
    tpu.vector_store %arg8[%c16, %c0_23], %27 {strides = array<i32>} : memref<216x256xf32, #tpu.memory_space<vmem>>, vector<8x256xf32>,
    %c0_i32_24 = arith.constant 0 : i32
    %29 = arith.addi %arg1, %c0_i32_24 : i32
    %c0_25 = arith.constant 0 : index
    %30 = arith.index_cast %29 : i32 to index
    %c0_26 = arith.constant 0 : index
    %c16_27 = arith.constant 16 : index
    %31 = vector.load %arg2[%c0_25, %30, %c0_26, %c16_27] : memref<1x10x8x290xf32, #tpu.memory_space<vmem>>, vector<1x1x8x256xf32>
    %32 = vector.shape_cast %31 : vector<1x1x8x256xf32> to vector<8x256xf32>
    %33 = vector.broadcast %3 : vector<1x256xf32> to vector<8x256xf32>
    %34 = arith.mulf %32, %33 : vector<8x256xf32>
    %c24 = arith.constant 24 : index
    %c0_28 = arith.constant 0 : index
    %35 = vector.load %arg8[%c24, %c0_28] : memref<216x256xf32, #tpu.memory_space<vmem>>, vector<8x256xf32>
    tpu.vector_store %arg8[%c24, %c0_28], %34 {strides = array<i32>} : memref<216x256xf32, #tpu.memory_space<vmem>>, vector<8x256xf32>,
    %c0_i32_29 = arith.constant 0 : i32
    %36 = arith.addi %arg1, %c0_i32_29 : i32
    %c0_30 = arith.constant 0 : index
    %37 = arith.index_cast %36 : i32 to index
    %c0_31 = arith.constant 0 : index
    %c17 = arith.constant 17 : index
    %38 = vector.load %arg2[%c0_30, %37, %c0_31, %c17] : memref<1x10x8x290xf32, #tpu.memory_space<vmem>>, vector<1x1x8x256xf32>
    %39 = vector.shape_cast %38 : vector<1x1x8x256xf32> to vector<8x256xf32>
    %c32 = arith.constant 32 : index
    %c0_32 = arith.constant 0 : index
    %40 = vector.load %arg8[%c32, %c0_32] : memref<216x256xf32, #tpu.memory_space<vmem>>, vector<8x256xf32>
    tpu.vector_store %arg8[%c32, %c0_32], %39 {strides = array<i32>} : memref<216x256xf32, #tpu.memory_space<vmem>>, vector<8x256xf32>,
    %c0_i32_33 = arith.constant 0 : i32
    %41 = arith.addi %arg1, %c0_i32_33 : i32
    %c0_34 = arith.constant 0 : index
    %42 = arith.index_cast %41 : i32 to index
    %c0_35 = arith.constant 0 : index
    %c18 = arith.constant 18 : index
    %43 = vector.load %arg2[%c0_34, %42, %c0_35, %c18] : memref<1x10x8x290xf32, #tpu.memory_space<vmem>>, vector<1x1x8x256xf32>
    %44 = vector.shape_cast %43 : vector<1x1x8x256xf32> to vector<8x256xf32>
    %45 = vector.broadcast %4 : vector<1x256xf32> to vector<8x256xf32>
    %46 = arith.mulf %44, %45 : vector<8x256xf32>
    %c40 = arith.constant 40 : index
    %c0_36 = arith.constant 0 : index
    %47 = vector.load %arg8[%c40, %c0_36] : memref<216x256xf32, #tpu.memory_space<vmem>>, vector<8x256xf32>
    tpu.vector_store %arg8[%c40, %c0_36], %46 {strides = array<i32>} : memref<216x256xf32, #tpu.memory_space<vmem>>, vector<8x256xf32>,
    %c0_i32_37 = arith.constant 0 : i32
    %48 = arith.addi %arg1, %c0_i32_37 : i32
    %c0_38 = arith.constant 0 : index
    %49 = arith.index_cast %48 : i32 to index
    %c0_39 = arith.constant 0 : index
    %c32_40 = arith.constant 32 : index
    %50 = vector.load %arg2[%c0_38, %49, %c0_39, %c32_40] : memref<1x10x8x290xf32, #tpu.memory_space<vmem>>, vector<1x1x8x256xf32>
    %51 = vector.shape_cast %50 : vector<1x1x8x256xf32> to vector<8x256xf32>
    %52 = vector.broadcast %5 : vector<1x256xf32> to vector<8x256xf32>
    %53 = arith.mulf %51, %52 : vector<8x256xf32>
    %c48 = arith.constant 48 : index
    %c0_41 = arith.constant 0 : index
    %54 = vector.load %arg8[%c48, %c0_41] : memref<216x256xf32, #tpu.memory_space<vmem>>, vector<8x256xf32>
    tpu.vector_store %arg8[%c48, %c0_41], %53 {strides = array<i32>} : memref<216x256xf32, #tpu.memory_space<vmem>>, vector<8x256xf32>,
    %c0_i32_42 = arith.constant 0 : i32
    %55 = arith.addi %arg1, %c0_i32_42 : i32
    %c0_43 = arith.constant 0 : index
    %56 = arith.index_cast %55 : i32 to index
    %c0_44 = arith.constant 0 : index
    %c33 = arith.constant 33 : index
    %57 = vector.load %arg2[%c0_43, %56, %c0_44, %c33] : memref<1x10x8x290xf32, #tpu.memory_space<vmem>>, vector<1x1x8x256xf32>
    %58 = vector.shape_cast %57 : vector<1x1x8x256xf32> to vector<8x256xf32>
    %59 = vector.broadcast %6 : vector<1x256xf32> to vector<8x256xf32>
    %60 = arith.mulf %58, %59 : vector<8x256xf32>
    %c56 = arith.constant 56 : index
    %c0_45 = arith.constant 0 : index
    %61 = vector.load %arg8[%c56, %c0_45] : memref<216x256xf32, #tpu.memory_space<vmem>>, vector<8x256xf32>
    tpu.vector_store %arg8[%c56, %c0_45], %60 {strides = array<i32>} : memref<216x256xf32, #tpu.memory_space<vmem>>, vector<8x256xf32>,
    %c0_i32_46 = arith.constant 0 : i32
    %62 = arith.addi %arg1, %c0_i32_46 : i32
    %c0_47 = arith.constant 0 : index
    %63 = arith.index_cast %62 : i32 to index
    %c0_48 = arith.constant 0 : index
    %c34 = arith.constant 34 : index
    %64 = vector.load %arg2[%c0_47, %63, %c0_48, %c34] : memref<1x10x8x290xf32, #tpu.memory_space<vmem>>, vector<1x1x8x256xf32>
    %65 = vector.shape_cast %64 : vector<1x1x8x256xf32> to vector<8x256xf32>
    %66 = vector.broadcast %7 : vector<1x256xf32> to vector<8x256xf32>
    %67 = arith.mulf %65, %66 : vector<8x256xf32>
    %c64 = arith.constant 64 : index
    %c0_49 = arith.constant 0 : index
    %68 = vector.load %arg8[%c64, %c0_49] : memref<216x256xf32, #tpu.memory_space<vmem>>, vector<8x256xf32>
    tpu.vector_store %arg8[%c64, %c0_49], %67 {strides = array<i32>} : memref<216x256xf32, #tpu.memory_space<vmem>>, vector<8x256xf32>,
    %c1_i32 = arith.constant 1 : i32
    %69 = arith.addi %arg1, %c1_i32 : i32
    %c0_50 = arith.constant 0 : index
    %70 = arith.index_cast %69 : i32 to index
    %c0_51 = arith.constant 0 : index
    %c0_52 = arith.constant 0 : index
    %71 = vector.load %arg2[%c0_50, %70, %c0_51, %c0_52] : memref<1x10x8x290xf32, #tpu.memory_space<vmem>>, vector<1x1x8x256xf32>
    %72 = vector.shape_cast %71 : vector<1x1x8x256xf32> to vector<8x256xf32>
    %73 = vector.broadcast %0 : vector<1x256xf32> to vector<8x256xf32>
    %74 = arith.mulf %72, %73 : vector<8x256xf32>
    %c72 = arith.constant 72 : index
    %c0_53 = arith.constant 0 : index
    %75 = vector.load %arg8[%c72, %c0_53] : memref<216x256xf32, #tpu.memory_space<vmem>>, vector<8x256xf32>
    tpu.vector_store %arg8[%c72, %c0_53], %74 {strides = array<i32>} : memref<216x256xf32, #tpu.memory_space<vmem>>, vector<8x256xf32>,
    %c1_i32_54 = arith.constant 1 : i32
    %76 = arith.addi %arg1, %c1_i32_54 : i32
    %c0_55 = arith.constant 0 : index
    %77 = arith.index_cast %76 : i32 to index
    %c0_56 = arith.constant 0 : index
    %c1_57 = arith.constant 1 : index
    %78 = vector.load %arg2[%c0_55, %77, %c0_56, %c1_57] : memref<1x10x8x290xf32, #tpu.memory_space<vmem>>, vector<1x1x8x256xf32>
    %79 = vector.shape_cast %78 : vector<1x1x8x256xf32> to vector<8x256xf32>
    %80 = vector.broadcast %1 : vector<1x256xf32> to vector<8x256xf32>
    %81 = arith.mulf %79, %80 : vector<8x256xf32>
    %c80 = arith.constant 80 : index
    %c0_58 = arith.constant 0 : index
    %82 = vector.load %arg8[%c80, %c0_58] : memref<216x256xf32, #tpu.memory_space<vmem>>, vector<8x256xf32>
    tpu.vector_store %arg8[%c80, %c0_58], %81 {strides = array<i32>} : memref<216x256xf32, #tpu.memory_space<vmem>>, vector<8x256xf32>,
    %c1_i32_59 = arith.constant 1 : i32
    %83 = arith.addi %arg1, %c1_i32_59 : i32
    %c0_60 = arith.constant 0 : index
    %84 = arith.index_cast %83 : i32 to index
    %c0_61 = arith.constant 0 : index
    %c2_62 = arith.constant 2 : index
    %85 = vector.load %arg2[%c0_60, %84, %c0_61, %c2_62] : memref<1x10x8x290xf32, #tpu.memory_space<vmem>>, vector<1x1x8x256xf32>
    %86 = vector.shape_cast %85 : vector<1x1x8x256xf32> to vector<8x256xf32>
    %87 = vector.broadcast %2 : vector<1x256xf32> to vector<8x256xf32>
    %88 = arith.mulf %86, %87 : vector<8x256xf32>
    %c88 = arith.constant 88 : index
    %c0_63 = arith.constant 0 : index
    %89 = vector.load %arg8[%c88, %c0_63] : memref<216x256xf32, #tpu.memory_space<vmem>>, vector<8x256xf32>
    tpu.vector_store %arg8[%c88, %c0_63], %88 {strides = array<i32>} : memref<216x256xf32, #tpu.memory_space<vmem>>, vector<8x256xf32>,
    %c1_i32_64 = arith.constant 1 : i32
    %90 = arith.addi %arg1, %c1_i32_64 : i32
    %c0_65 = arith.constant 0 : index
    %91 = arith.index_cast %90 : i32 to index
    %c0_66 = arith.constant 0 : index
    %c16_67 = arith.constant 16 : index
    %92 = vector.load %arg2[%c0_65, %91, %c0_66, %c16_67] : memref<1x10x8x290xf32, #tpu.memory_space<vmem>>, vector<1x1x8x256xf32>
    %93 = vector.shape_cast %92 : vector<1x1x8x256xf32> to vector<8x256xf32>
    %94 = vector.broadcast %3 : vector<1x256xf32> to vector<8x256xf32>
    %95 = arith.mulf %93, %94 : vector<8x256xf32>
    %c96 = arith.constant 96 : index
    %c0_68 = arith.constant 0 : index
    %96 = vector.load %arg8[%c96, %c0_68] : memref<216x256xf32, #tpu.memory_space<vmem>>, vector<8x256xf32>
    tpu.vector_store %arg8[%c96, %c0_68], %95 {strides = array<i32>} : memref<216x256xf32, #tpu.memory_space<vmem>>, vector<8x256xf32>,
    %c1_i32_69 = arith.constant 1 : i32
    %97 = arith.addi %arg1, %c1_i32_69 : i32
    %c0_70 = arith.constant 0 : index
    %98 = arith.index_cast %97 : i32 to index
    %c0_71 = arith.constant 0 : index
    %c17_72 = arith.constant 17 : index
    %99 = vector.load %arg2[%c0_70, %98, %c0_71, %c17_72] : memref<1x10x8x290xf32, #tpu.memory_space<vmem>>, vector<1x1x8x256xf32>
    %100 = vector.shape_cast %99 : vector<1x1x8x256xf32> to vector<8x256xf32>
    %c104 = arith.constant 104 : index
    %c0_73 = arith.constant 0 : index
    %101 = vector.load %arg8[%c104, %c0_73] : memref<216x256xf32, #tpu.memory_space<vmem>>, vector<8x256xf32>
    tpu.vector_store %arg8[%c104, %c0_73], %100 {strides = array<i32>} : memref<216x256xf32, #tpu.memory_space<vmem>>, vector<8x256xf32>,
    %c1_i32_74 = arith.constant 1 : i32
    %102 = arith.addi %arg1, %c1_i32_74 : i32
    %c0_75 = arith.constant 0 : index
    %103 = arith.index_cast %102 : i32 to index
    %c0_76 = arith.constant 0 : index
    %c18_77 = arith.constant 18 : index
    %104 = vector.load %arg2[%c0_75, %103, %c0_76, %c18_77] : memref<1x10x8x290xf32, #tpu.memory_space<vmem>>, vector<1x1x8x256xf32>
    %105 = vector.shape_cast %104 : vector<1x1x8x256xf32> to vector<8x256xf32>
    %106 = vector.broadcast %4 : vector<1x256xf32> to vector<8x256xf32>
    %107 = arith.mulf %105, %106 : vector<8x256xf32>
    %c112 = arith.constant 112 : index
    %c0_78 = arith.constant 0 : index
    %108 = vector.load %arg8[%c112, %c0_78] : memref<216x256xf32, #tpu.memory_space<vmem>>, vector<8x256xf32>
    tpu.vector_store %arg8[%c112, %c0_78], %107 {strides = array<i32>} : memref<216x256xf32, #tpu.memory_space<vmem>>, vector<8x256xf32>,
    %c1_i32_79 = arith.constant 1 : i32
    %109 = arith.addi %arg1, %c1_i32_79 : i32
    %c0_80 = arith.constant 0 : index
    %110 = arith.index_cast %109 : i32 to index
    %c0_81 = arith.constant 0 : index
    %c32_82 = arith.constant 32 : index
    %111 = vector.load %arg2[%c0_80, %110, %c0_81, %c32_82] : memref<1x10x8x290xf32, #tpu.memory_space<vmem>>, vector<1x1x8x256xf32>
    %112 = vector.shape_cast %111 : vector<1x1x8x256xf32> to vector<8x256xf32>
    %113 = vector.broadcast %5 : vector<1x256xf32> to vector<8x256xf32>
    %114 = arith.mulf %112, %113 : vector<8x256xf32>
    %c120 = arith.constant 120 : index
    %c0_83 = arith.constant 0 : index
    %115 = vector.load %arg8[%c120, %c0_83] : memref<216x256xf32, #tpu.memory_space<vmem>>, vector<8x256xf32>
    tpu.vector_store %arg8[%c120, %c0_83], %114 {strides = array<i32>} : memref<216x256xf32, #tpu.memory_space<vmem>>, vector<8x256xf32>,
    %c1_i32_84 = arith.constant 1 : i32
    %116 = arith.addi %arg1, %c1_i32_84 : i32
    %c0_85 = arith.constant 0 : index
    %117 = arith.index_cast %116 : i32 to index
    %c0_86 = arith.constant 0 : index
    %c33_87 = arith.constant 33 : index
    %118 = vector.load %arg2[%c0_85, %117, %c0_86, %c33_87] : memref<1x10x8x290xf32, #tpu.memory_space<vmem>>, vector<1x1x8x256xf32>
    %119 = vector.shape_cast %118 : vector<1x1x8x256xf32> to vector<8x256xf32>
    %120 = vector.broadcast %6 : vector<1x256xf32> to vector<8x256xf32>
    %121 = arith.mulf %119, %120 : vector<8x256xf32>
    %c128 = arith.constant 128 : index
    %c0_88 = arith.constant 0 : index
    %122 = vector.load %arg8[%c128, %c0_88] : memref<216x256xf32, #tpu.memory_space<vmem>>, vector<8x256xf32>
    tpu.vector_store %arg8[%c128, %c0_88], %121 {strides = array<i32>} : memref<216x256xf32, #tpu.memory_space<vmem>>, vector<8x256xf32>,
    %c1_i32_89 = arith.constant 1 : i32
    %123 = arith.addi %arg1, %c1_i32_89 : i32
    %c0_90 = arith.constant 0 : index
    %124 = arith.index_cast %123 : i32 to index
    %c0_91 = arith.constant 0 : index
    %c34_92 = arith.constant 34 : index
    %125 = vector.load %arg2[%c0_90, %124, %c0_91, %c34_92] : memref<1x10x8x290xf32, #tpu.memory_space<vmem>>, vector<1x1x8x256xf32>
    %126 = vector.shape_cast %125 : vector<1x1x8x256xf32> to vector<8x256xf32>
    %127 = vector.broadcast %7 : vector<1x256xf32> to vector<8x256xf32>
    %128 = arith.mulf %126, %127 : vector<8x256xf32>
    %c136 = arith.constant 136 : index
    %c0_93 = arith.constant 0 : index
    %129 = vector.load %arg8[%c136, %c0_93] : memref<216x256xf32, #tpu.memory_space<vmem>>, vector<8x256xf32>
    tpu.vector_store %arg8[%c136, %c0_93], %128 {strides = array<i32>} : memref<216x256xf32, #tpu.memory_space<vmem>>, vector<8x256xf32>,
    %c2_i32 = arith.constant 2 : i32
    %130 = arith.addi %arg1, %c2_i32 : i32
    %c0_94 = arith.constant 0 : index
    %131 = arith.index_cast %130 : i32 to index
    %c0_95 = arith.constant 0 : index
    %c0_96 = arith.constant 0 : index
    %132 = vector.load %arg2[%c0_94, %131, %c0_95, %c0_96] : memref<1x10x8x290xf32, #tpu.memory_space<vmem>>, vector<1x1x8x256xf32>
    %133 = vector.shape_cast %132 : vector<1x1x8x256xf32> to vector<8x256xf32>
    %134 = vector.broadcast %0 : vector<1x256xf32> to vector<8x256xf32>
    %135 = arith.mulf %133, %134 : vector<8x256xf32>
    %c144 = arith.constant 144 : index
    %c0_97 = arith.constant 0 : index
    %136 = vector.load %arg8[%c144, %c0_97] : memref<216x256xf32, #tpu.memory_space<vmem>>, vector<8x256xf32>
    tpu.vector_store %arg8[%c144, %c0_97], %135 {strides = array<i32>} : memref<216x256xf32, #tpu.memory_space<vmem>>, vector<8x256xf32>,
    %c2_i32_98 = arith.constant 2 : i32
    %137 = arith.addi %arg1, %c2_i32_98 : i32
    %c0_99 = arith.constant 0 : index
    %138 = arith.index_cast %137 : i32 to index
    %c0_100 = arith.constant 0 : index
    %c1_101 = arith.constant 1 : index
    %139 = vector.load %arg2[%c0_99, %138, %c0_100, %c1_101] : memref<1x10x8x290xf32, #tpu.memory_space<vmem>>, vector<1x1x8x256xf32>
    %140 = vector.shape_cast %139 : vector<1x1x8x256xf32> to vector<8x256xf32>
    %141 = vector.broadcast %1 : vector<1x256xf32> to vector<8x256xf32>
    %142 = arith.mulf %140, %141 : vector<8x256xf32>
    %c152 = arith.constant 152 : index
    %c0_102 = arith.constant 0 : index
    %143 = vector.load %arg8[%c152, %c0_102] : memref<216x256xf32, #tpu.memory_space<vmem>>, vector<8x256xf32>
    tpu.vector_store %arg8[%c152, %c0_102], %142 {strides = array<i32>} : memref<216x256xf32, #tpu.memory_space<vmem>>, vector<8x256xf32>,
    %c2_i32_103 = arith.constant 2 : i32
    %144 = arith.addi %arg1, %c2_i32_103 : i32
    %c0_104 = arith.constant 0 : index
    %145 = arith.index_cast %144 : i32 to index
    %c0_105 = arith.constant 0 : index
    %c2_106 = arith.constant 2 : index
    %146 = vector.load %arg2[%c0_104, %145, %c0_105, %c2_106] : memref<1x10x8x290xf32, #tpu.memory_space<vmem>>, vector<1x1x8x256xf32>
    %147 = vector.shape_cast %146 : vector<1x1x8x256xf32> to vector<8x256xf32>
    %148 = vector.broadcast %2 : vector<1x256xf32> to vector<8x256xf32>
    %149 = arith.mulf %147, %148 : vector<8x256xf32>
    %c160 = arith.constant 160 : index
    %c0_107 = arith.constant 0 : index
    %150 = vector.load %arg8[%c160, %c0_107] : memref<216x256xf32, #tpu.memory_space<vmem>>, vector<8x256xf32>
    tpu.vector_store %arg8[%c160, %c0_107], %149 {strides = array<i32>} : memref<216x256xf32, #tpu.memory_space<vmem>>, vector<8x256xf32>,
    %c2_i32_108 = arith.constant 2 : i32
    %151 = arith.addi %arg1, %c2_i32_108 : i32
    %c0_109 = arith.constant 0 : index
    %152 = arith.index_cast %151 : i32 to index
    %c0_110 = arith.constant 0 : index
    %c16_111 = arith.constant 16 : index
    %153 = vector.load %arg2[%c0_109, %152, %c0_110, %c16_111] : memref<1x10x8x290xf32, #tpu.memory_space<vmem>>, vector<1x1x8x256xf32>
    %154 = vector.shape_cast %153 : vector<1x1x8x256xf32> to vector<8x256xf32>
    %155 = vector.broadcast %3 : vector<1x256xf32> to vector<8x256xf32>
    %156 = arith.mulf %154, %155 : vector<8x256xf32>
    %c168 = arith.constant 168 : index
    %c0_112 = arith.constant 0 : index
    %157 = vector.load %arg8[%c168, %c0_112] : memref<216x256xf32, #tpu.memory_space<vmem>>, vector<8x256xf32>
    tpu.vector_store %arg8[%c168, %c0_112], %156 {strides = array<i32>} : memref<216x256xf32, #tpu.memory_space<vmem>>, vector<8x256xf32>,
    %c2_i32_113 = arith.constant 2 : i32
    %158 = arith.addi %arg1, %c2_i32_113 : i32
    %c0_114 = arith.constant 0 : index
    %159 = arith.index_cast %158 : i32 to index
    %c0_115 = arith.constant 0 : index
    %c17_116 = arith.constant 17 : index
    %160 = vector.load %arg2[%c0_114, %159, %c0_115, %c17_116] : memref<1x10x8x290xf32, #tpu.memory_space<vmem>>, vector<1x1x8x256xf32>
    %161 = vector.shape_cast %160 : vector<1x1x8x256xf32> to vector<8x256xf32>
    %c176 = arith.constant 176 : index
    %c0_117 = arith.constant 0 : index
    %162 = vector.load %arg8[%c176, %c0_117] : memref<216x256xf32, #tpu.memory_space<vmem>>, vector<8x256xf32>
    tpu.vector_store %arg8[%c176, %c0_117], %161 {strides = array<i32>} : memref<216x256xf32, #tpu.memory_space<vmem>>, vector<8x256xf32>,
    %c2_i32_118 = arith.constant 2 : i32
    %163 = arith.addi %arg1, %c2_i32_118 : i32
    %c0_119 = arith.constant 0 : index
    %164 = arith.index_cast %163 : i32 to index
    %c0_120 = arith.constant 0 : index
    %c18_121 = arith.constant 18 : index
    %165 = vector.load %arg2[%c0_119, %164, %c0_120, %c18_121] : memref<1x10x8x290xf32, #tpu.memory_space<vmem>>, vector<1x1x8x256xf32>
    %166 = vector.shape_cast %165 : vector<1x1x8x256xf32> to vector<8x256xf32>
    %167 = vector.broadcast %4 : vector<1x256xf32> to vector<8x256xf32>
    %168 = arith.mulf %166, %167 : vector<8x256xf32>
    %c184 = arith.constant 184 : index
    %c0_122 = arith.constant 0 : index
    %169 = vector.load %arg8[%c184, %c0_122] : memref<216x256xf32, #tpu.memory_space<vmem>>, vector<8x256xf32>
    tpu.vector_store %arg8[%c184, %c0_122], %168 {strides = array<i32>} : memref<216x256xf32, #tpu.memory_space<vmem>>, vector<8x256xf32>,
    %c2_i32_123 = arith.constant 2 : i32
    %170 = arith.addi %arg1, %c2_i32_123 : i32
    %c0_124 = arith.constant 0 : index
    %171 = arith.index_cast %170 : i32 to index
    %c0_125 = arith.constant 0 : index
    %c32_126 = arith.constant 32 : index
    %172 = vector.load %arg2[%c0_124, %171, %c0_125, %c32_126] : memref<1x10x8x290xf32, #tpu.memory_space<vmem>>, vector<1x1x8x256xf32>
    %173 = vector.shape_cast %172 : vector<1x1x8x256xf32> to vector<8x256xf32>
    %174 = vector.broadcast %5 : vector<1x256xf32> to vector<8x256xf32>
    %175 = arith.mulf %173, %174 : vector<8x256xf32>
    %c192 = arith.constant 192 : index
    %c0_127 = arith.constant 0 : index
    %176 = vector.load %arg8[%c192, %c0_127] : memref<216x256xf32, #tpu.memory_space<vmem>>, vector<8x256xf32>
    tpu.vector_store %arg8[%c192, %c0_127], %175 {strides = array<i32>} : memref<216x256xf32, #tpu.memory_space<vmem>>, vector<8x256xf32>,
    %c2_i32_128 = arith.constant 2 : i32
    %177 = arith.addi %arg1, %c2_i32_128 : i32
    %c0_129 = arith.constant 0 : index
    %178 = arith.index_cast %177 : i32 to index
    %c0_130 = arith.constant 0 : index
    %c33_131 = arith.constant 33 : index
    %179 = vector.load %arg2[%c0_129, %178, %c0_130, %c33_131] : memref<1x10x8x290xf32, #tpu.memory_space<vmem>>, vector<1x1x8x256xf32>
    %180 = vector.shape_cast %179 : vector<1x1x8x256xf32> to vector<8x256xf32>
    %181 = vector.broadcast %6 : vector<1x256xf32> to vector<8x256xf32>
    %182 = arith.mulf %180, %181 : vector<8x256xf32>
    %c200 = arith.constant 200 : index
    %c0_132 = arith.constant 0 : index
    %183 = vector.load %arg8[%c200, %c0_132] : memref<216x256xf32, #tpu.memory_space<vmem>>, vector<8x256xf32>
    tpu.vector_store %arg8[%c200, %c0_132], %182 {strides = array<i32>} : memref<216x256xf32, #tpu.memory_space<vmem>>, vector<8x256xf32>,
    %c2_i32_133 = arith.constant 2 : i32
    %184 = arith.addi %arg1, %c2_i32_133 : i32
    %c0_134 = arith.constant 0 : index
    %185 = arith.index_cast %184 : i32 to index
    %c0_135 = arith.constant 0 : index
    %c34_136 = arith.constant 34 : index
    %186 = vector.load %arg2[%c0_134, %185, %c0_135, %c34_136] : memref<1x10x8x290xf32, #tpu.memory_space<vmem>>, vector<1x1x8x256xf32>
    %187 = vector.shape_cast %186 : vector<1x1x8x256xf32> to vector<8x256xf32>
    %188 = vector.broadcast %7 : vector<1x256xf32> to vector<8x256xf32>
    %189 = arith.mulf %187, %188 : vector<8x256xf32>
    %c208 = arith.constant 208 : index
    %c0_137 = arith.constant 0 : index
    %190 = vector.load %arg8[%c208, %c0_137] : memref<216x256xf32, #tpu.memory_space<vmem>>, vector<8x256xf32>
    tpu.vector_store %arg8[%c208, %c0_137], %189 {strides = array<i32>} : memref<216x256xf32, #tpu.memory_space<vmem>>, vector<8x256xf32>,
    %c0_138 = arith.constant 0 : index
    %c0_139 = arith.constant 0 : index
    %191 = vector.load %arg3[%c0_138, %c0_139] : memref<8x216xf32, #tpu.memory_space<vmem>>, vector<8x216xf32>
    %c0_140 = arith.constant 0 : index
    %c0_141 = arith.constant 0 : index
    %192 = vector.load %arg8[%c0_140, %c0_141] : memref<216x256xf32, #tpu.memory_space<vmem>>, vector<216x256xf32>
    %cst = arith.constant dense<0.000000e+00> : vector<8x256xf32>
    %193 = tpu.matmul %191, %192, %cst {dimension_numbers = #tpu.dot_dimension_numbers<[1], [0], [0], [1], [0, 0, 1, 1], [], []>} : vector<8x216xf32>, vector<216x256xf32>, vector<8x256xf32> -> vector<8x256xf32>
    %c0_142 = arith.constant 0 : index
    %c0_143 = arith.constant 0 : index
    %c0_144 = arith.constant 0 : index
    %c0_145 = arith.constant 0 : index
    %194 = vector.load %arg5[%c0_142, %c0_143, %c0_144, %c0_145] : memref<1x1x8x256xf32, #tpu.memory_space<vmem>>, vector<1x1x8x256xf32>
    %195 = vector.shape_cast %194 : vector<1x1x8x256xf32> to vector<8x256xf32>
    %196 = vector.shape_cast %193 : vector<8x256xf32> to vector<1x1x8x256xf32>
    tpu.vector_store %arg5[%c0_142, %c0_143, %c0_144, %c0_145], %196 {strides = array<i32>} : memref<1x1x8x256xf32, #tpu.memory_space<vmem>>, vector<1x1x8x256xf32>,
    %cst_146 = arith.constant dense<0.000000e+00> : vector<8xf32>
    %197 = vector.multi_reduction <add>, %193, %cst_146 [1] : vector<8x256xf32> to vector<8xf32>
    %198 = vector.shape_cast %197 : vector<8xf32> to vector<8x1xf32>
    %199 = arith.mulf %193, %193 : vector<8x256xf32>
    %cst_147 = arith.constant dense<0.000000e+00> : vector<8xf32>
    %200 = vector.multi_reduction <add>, %199, %cst_147 [1] : vector<8x256xf32> to vector<8xf32>
    %201 = vector.shape_cast %200 : vector<8xf32> to vector<8x1xf32>
    %c0_i32_148 = arith.constant 0 : i32
    %202 = arith.cmpi eq, %arg1, %c0_i32_148 : i32
    %203 = arith.extui %202 : i1 to i32
    %c0_i32_149 = arith.constant 0 : i32
    %204 = arith.cmpi ne, %203, %c0_i32_149 : i32
    scf.if %204 {
      %c0_152 = arith.constant 0 : index
      %c0_153 = arith.constant 0 : index
      %c0_154 = arith.constant 0 : index
      %208 = vector.load %arg6[%c0_152, %c0_153, %c0_154] : memref<1x8x1xf32, #tpu.memory_space<vmem>>, vector<1x8x1xf32>
      %209 = vector.shape_cast %208 : vector<1x8x1xf32> to vector<8x1xf32>
      %210 = vector.shape_cast %198 : vector<8x1xf32> to vector<1x8x1xf32>
      tpu.vector_store %arg6[%c0_152, %c0_153, %c0_154], %210 {strides = array<i32>} : memref<1x8x1xf32, #tpu.memory_space<vmem>>, vector<1x8x1xf32>,
      %c0_155 = arith.constant 0 : index
      %c0_156 = arith.constant 0 : index
      %c0_157 = arith.constant 0 : index
      %211 = vector.load %arg7[%c0_155, %c0_156, %c0_157] : memref<1x8x1xf32, #tpu.memory_space<vmem>>, vector<1x8x1xf32>
      %212 = vector.shape_cast %211 : vector<1x8x1xf32> to vector<8x1xf32>
      %213 = vector.shape_cast %201 : vector<8x1xf32> to vector<1x8x1xf32>
      tpu.vector_store %arg7[%c0_155, %c0_156, %c0_157], %213 {strides = array<i32>} : memref<1x8x1xf32, #tpu.memory_space<vmem>>, vector<1x8x1xf32>,
    } else {
    }
    %c0_i32_150 = arith.constant 0 : i32
    %205 = arith.cmpi sgt, %arg1, %c0_i32_150 : i32
    %206 = arith.extui %205 : i1 to i32
    %c0_i32_151 = arith.constant 0 : i32
    %207 = arith.cmpi ne, %206, %c0_i32_151 : i32
    scf.if %207 {
      %c0_152 = arith.constant 0 : index
      %c0_153 = arith.constant 0 : index
      %c0_154 = arith.constant 0 : index
      %208 = vector.load %arg6[%c0_152, %c0_153, %c0_154] : memref<1x8x1xf32, #tpu.memory_space<vmem>>, vector<1x8x1xf32>
      %209 = vector.shape_cast %208 : vector<1x8x1xf32> to vector<8x1xf32>
      %210 = arith.addf %209, %198 : vector<8x1xf32>
      %c0_155 = arith.constant 0 : index
      %c0_156 = arith.constant 0 : index
      %c0_157 = arith.constant 0 : index
      %211 = vector.load %arg6[%c0_155, %c0_156, %c0_157] : memref<1x8x1xf32, #tpu.memory_space<vmem>>, vector<1x8x1xf32>
      %212 = vector.shape_cast %211 : vector<1x8x1xf32> to vector<8x1xf32>
      %213 = vector.shape_cast %210 : vector<8x1xf32> to vector<1x8x1xf32>
      tpu.vector_store %arg6[%c0_155, %c0_156, %c0_157], %213 {strides = array<i32>} : memref<1x8x1xf32, #tpu.memory_space<vmem>>, vector<1x8x1xf32>,
      %c0_158 = arith.constant 0 : index
      %c0_159 = arith.constant 0 : index
      %c0_160 = arith.constant 0 : index
      %214 = vector.load %arg7[%c0_158, %c0_159, %c0_160] : memref<1x8x1xf32, #tpu.memory_space<vmem>>, vector<1x8x1xf32>
      %215 = vector.shape_cast %214 : vector<1x8x1xf32> to vector<8x1xf32>
      %216 = arith.addf %215, %201 : vector<8x1xf32>
      %c0_161 = arith.constant 0 : index
      %c0_162 = arith.constant 0 : index
      %c0_163 = arith.constant 0 : index
      %217 = vector.load %arg7[%c0_161, %c0_162, %c0_163] : memref<1x8x1xf32, #tpu.memory_space<vmem>>, vector<1x8x1xf32>
      %218 = vector.shape_cast %217 : vector<1x8x1xf32> to vector<8x1xf32>
      %219 = vector.shape_cast %216 : vector<8x1xf32> to vector<1x8x1xf32>
      tpu.vector_store %arg7[%c0_161, %c0_162, %c0_163], %219 {strides = array<i32>} : memref<1x8x1xf32, #tpu.memory_space<vmem>>, vector<1x8x1xf32>,
    } else {
    }
    return
  }
  func.func @transform_0(%arg0: i32, %arg1: i32) -> (i32, i32, i32, i32) {
    %c0_i32 = arith.constant 0 : i32
    %c0_i32_0 = arith.constant 0 : i32
    %c0_i32_1 = arith.constant 0 : i32
    %c0_i32_2 = arith.constant 0 : i32
    return %arg0, %c0_i32, %c0_i32_0, %c0_i32_1 : i32, i32, i32, i32
  }
  func.func @transform_1(%arg0: i32, %arg1: i32) -> (i32, i32) {
    %c0_i32 = arith.constant 0 : i32
    %c0_i32_0 = arith.constant 0 : i32
    %c0_i32_1 = arith.constant 0 : i32
    return %c0_i32, %c0_i32_0 : i32, i32
  }
  func.func @transform_2(%arg0: i32, %arg1: i32) -> (i32, i32) {
    %c0_i32 = arith.constant 0 : i32
    %c0_i32_0 = arith.constant 0 : i32
    %c0_i32_1 = arith.constant 0 : i32
    return %c0_i32, %c0_i32_0 : i32, i32
  }
  func.func @transform_3(%arg0: i32, %arg1: i32) -> (i32, i32, i32, i32) {
    %c0_i32 = arith.constant 0 : i32
    %c0_i32_0 = arith.constant 0 : i32
    %c0_i32_1 = arith.constant 0 : i32
    return %arg0, %arg1, %c0_i32, %c0_i32_0 : i32, i32, i32, i32
  }
  func.func @transform_4(%arg0: i32, %arg1: i32) -> (i32, i32, i32) {
    %c0_i32 = arith.constant 0 : i32
    %c0_i32_0 = arith.constant 0 : i32
    %c0_i32_1 = arith.constant 0 : i32
    return %arg0, %c0_i32, %c0_i32_0 : i32, i32, i32
  }
  func.func @transform_5(%arg0: i32, %arg1: i32) -> (i32, i32, i32) {
    %c0_i32 = arith.constant 0 : i32
    %c0_i32_0 = arith.constant 0 : i32
    %c0_i32_1 = arith.constant 0 : i32
    return %arg0, %c0_i32, %c0_i32_0 : i32, i32, i32
  }
}

module attributes {stable_mosaic.version = 11 : i64} {
  func.func @_bn_lrelu_kernel(%arg0: i32, %arg1: i32, %arg2: memref<1x8x8x256xf32, #tpu.memory_space<vmem>>, %arg3: memref<8x1xf32, #tpu.memory_space<vmem>>, %arg4: memref<8x1xf32, #tpu.memory_space<vmem>>, %arg5: memref<1x8x8x256xf32, #tpu.memory_space<vmem>>) attributes {dimension_semantics = [#tpu.dimension_semantics<parallel>, #tpu.dimension_semantics<parallel>], iteration_bounds = array<i64: 2, 1>, scalar_prefetch = 0 : i64, scratch_operands = 0 : i64, tpu.core_type = #tpu.core_type<tc>, window_params = [{transform_indices = @transform_0, window_bounds = array<i64: 1, 8, 8, 256>}, {pipeline_mode = #tpu.pipeline_mode<synchronous>, transform_indices = @transform_1, window_bounds = array<i64: 8, 1>}, {pipeline_mode = #tpu.pipeline_mode<synchronous>, transform_indices = @transform_2, window_bounds = array<i64: 8, 1>}, {transform_indices = @transform_3, window_bounds = array<i64: 1, 8, 8, 256>}]} {
    %c0 = arith.constant 0 : index
    %c0_0 = arith.constant 0 : index
    %c0_1 = arith.constant 0 : index
    %c0_2 = arith.constant 0 : index
    %0 = vector.load %arg2[%c0, %c0_0, %c0_1, %c0_2] : memref<1x8x8x256xf32, #tpu.memory_space<vmem>>, vector<1x1x8x256xf32>
    %1 = vector.shape_cast %0 : vector<1x1x8x256xf32> to vector<8x256xf32>
    %c0_3 = arith.constant 0 : index
    %c0_4 = arith.constant 0 : index
    %2 = vector.load %arg3[%c0_3, %c0_4] : memref<8x1xf32, #tpu.memory_space<vmem>>, vector<8x1xf32>
    %3 = vector.broadcast %2 : vector<8x1xf32> to vector<8x256xf32>
    %4 = arith.mulf %1, %3 : vector<8x256xf32>
    %c0_5 = arith.constant 0 : index
    %c0_6 = arith.constant 0 : index
    %5 = vector.load %arg4[%c0_5, %c0_6] : memref<8x1xf32, #tpu.memory_space<vmem>>, vector<8x1xf32>
    %6 = vector.broadcast %5 : vector<8x1xf32> to vector<8x256xf32>
    %7 = arith.addf %4, %6 : vector<8x256xf32>
    %cst = arith.constant 0.000000e+00 : f32
    %8 = vector.broadcast %cst : f32 to vector<8x256xf32>
    %9 = arith.cmpf ogt, %7, %8 : vector<8x256xf32>
    %cst_7 = arith.constant 0.00999999977 : f32
    %10 = vector.broadcast %cst_7 : f32 to vector<8x256xf32>
    %11 = arith.mulf %10, %7 : vector<8x256xf32>
    %12 = arith.select %9, %7, %11 : vector<8x256xi1>, vector<8x256xf32>
    %c0_8 = arith.constant 0 : index
    %c0_9 = arith.constant 0 : index
    %c0_10 = arith.constant 0 : index
    %c0_11 = arith.constant 0 : index
    %13 = vector.load %arg5[%c0_8, %c0_9, %c0_10, %c0_11] : memref<1x8x8x256xf32, #tpu.memory_space<vmem>>, vector<1x8x1x256xf32>
    %14 = vector.shape_cast %13 : vector<1x8x1x256xf32> to vector<8x256xf32>
    %15 = vector.shape_cast %12 : vector<8x256xf32> to vector<1x8x1x256xf32>
    tpu.vector_store %arg5[%c0_8, %c0_9, %c0_10, %c0_11], %15 {strides = array<i32>} : memref<1x8x8x256xf32, #tpu.memory_space<vmem>>, vector<1x8x1x256xf32>,
    %c0_12 = arith.constant 0 : index
    %c1 = arith.constant 1 : index
    %c0_13 = arith.constant 0 : index
    %c0_14 = arith.constant 0 : index
    %16 = vector.load %arg2[%c0_12, %c1, %c0_13, %c0_14] : memref<1x8x8x256xf32, #tpu.memory_space<vmem>>, vector<1x1x8x256xf32>
    %17 = vector.shape_cast %16 : vector<1x1x8x256xf32> to vector<8x256xf32>
    %c0_15 = arith.constant 0 : index
    %c0_16 = arith.constant 0 : index
    %18 = vector.load %arg3[%c0_15, %c0_16] : memref<8x1xf32, #tpu.memory_space<vmem>>, vector<8x1xf32>
    %19 = vector.broadcast %18 : vector<8x1xf32> to vector<8x256xf32>
    %20 = arith.mulf %17, %19 : vector<8x256xf32>
    %c0_17 = arith.constant 0 : index
    %c0_18 = arith.constant 0 : index
    %21 = vector.load %arg4[%c0_17, %c0_18] : memref<8x1xf32, #tpu.memory_space<vmem>>, vector<8x1xf32>
    %22 = vector.broadcast %21 : vector<8x1xf32> to vector<8x256xf32>
    %23 = arith.addf %20, %22 : vector<8x256xf32>
    %cst_19 = arith.constant 0.000000e+00 : f32
    %24 = vector.broadcast %cst_19 : f32 to vector<8x256xf32>
    %25 = arith.cmpf ogt, %23, %24 : vector<8x256xf32>
    %cst_20 = arith.constant 0.00999999977 : f32
    %26 = vector.broadcast %cst_20 : f32 to vector<8x256xf32>
    %27 = arith.mulf %26, %23 : vector<8x256xf32>
    %28 = arith.select %25, %23, %27 : vector<8x256xi1>, vector<8x256xf32>
    %c0_21 = arith.constant 0 : index
    %c0_22 = arith.constant 0 : index
    %c1_23 = arith.constant 1 : index
    %c0_24 = arith.constant 0 : index
    %29 = vector.load %arg5[%c0_21, %c0_22, %c1_23, %c0_24] : memref<1x8x8x256xf32, #tpu.memory_space<vmem>>, vector<1x8x1x256xf32>
    %30 = vector.shape_cast %29 : vector<1x8x1x256xf32> to vector<8x256xf32>
    %31 = vector.shape_cast %28 : vector<8x256xf32> to vector<1x8x1x256xf32>
    tpu.vector_store %arg5[%c0_21, %c0_22, %c1_23, %c0_24], %31 {strides = array<i32>} : memref<1x8x8x256xf32, #tpu.memory_space<vmem>>, vector<1x8x1x256xf32>,
    %c0_25 = arith.constant 0 : index
    %c2 = arith.constant 2 : index
    %c0_26 = arith.constant 0 : index
    %c0_27 = arith.constant 0 : index
    %32 = vector.load %arg2[%c0_25, %c2, %c0_26, %c0_27] : memref<1x8x8x256xf32, #tpu.memory_space<vmem>>, vector<1x1x8x256xf32>
    %33 = vector.shape_cast %32 : vector<1x1x8x256xf32> to vector<8x256xf32>
    %c0_28 = arith.constant 0 : index
    %c0_29 = arith.constant 0 : index
    %34 = vector.load %arg3[%c0_28, %c0_29] : memref<8x1xf32, #tpu.memory_space<vmem>>, vector<8x1xf32>
    %35 = vector.broadcast %34 : vector<8x1xf32> to vector<8x256xf32>
    %36 = arith.mulf %33, %35 : vector<8x256xf32>
    %c0_30 = arith.constant 0 : index
    %c0_31 = arith.constant 0 : index
    %37 = vector.load %arg4[%c0_30, %c0_31] : memref<8x1xf32, #tpu.memory_space<vmem>>, vector<8x1xf32>
    %38 = vector.broadcast %37 : vector<8x1xf32> to vector<8x256xf32>
    %39 = arith.addf %36, %38 : vector<8x256xf32>
    %cst_32 = arith.constant 0.000000e+00 : f32
    %40 = vector.broadcast %cst_32 : f32 to vector<8x256xf32>
    %41 = arith.cmpf ogt, %39, %40 : vector<8x256xf32>
    %cst_33 = arith.constant 0.00999999977 : f32
    %42 = vector.broadcast %cst_33 : f32 to vector<8x256xf32>
    %43 = arith.mulf %42, %39 : vector<8x256xf32>
    %44 = arith.select %41, %39, %43 : vector<8x256xi1>, vector<8x256xf32>
    %c0_34 = arith.constant 0 : index
    %c0_35 = arith.constant 0 : index
    %c2_36 = arith.constant 2 : index
    %c0_37 = arith.constant 0 : index
    %45 = vector.load %arg5[%c0_34, %c0_35, %c2_36, %c0_37] : memref<1x8x8x256xf32, #tpu.memory_space<vmem>>, vector<1x8x1x256xf32>
    %46 = vector.shape_cast %45 : vector<1x8x1x256xf32> to vector<8x256xf32>
    %47 = vector.shape_cast %44 : vector<8x256xf32> to vector<1x8x1x256xf32>
    tpu.vector_store %arg5[%c0_34, %c0_35, %c2_36, %c0_37], %47 {strides = array<i32>} : memref<1x8x8x256xf32, #tpu.memory_space<vmem>>, vector<1x8x1x256xf32>,
    %c0_38 = arith.constant 0 : index
    %c3 = arith.constant 3 : index
    %c0_39 = arith.constant 0 : index
    %c0_40 = arith.constant 0 : index
    %48 = vector.load %arg2[%c0_38, %c3, %c0_39, %c0_40] : memref<1x8x8x256xf32, #tpu.memory_space<vmem>>, vector<1x1x8x256xf32>
    %49 = vector.shape_cast %48 : vector<1x1x8x256xf32> to vector<8x256xf32>
    %c0_41 = arith.constant 0 : index
    %c0_42 = arith.constant 0 : index
    %50 = vector.load %arg3[%c0_41, %c0_42] : memref<8x1xf32, #tpu.memory_space<vmem>>, vector<8x1xf32>
    %51 = vector.broadcast %50 : vector<8x1xf32> to vector<8x256xf32>
    %52 = arith.mulf %49, %51 : vector<8x256xf32>
    %c0_43 = arith.constant 0 : index
    %c0_44 = arith.constant 0 : index
    %53 = vector.load %arg4[%c0_43, %c0_44] : memref<8x1xf32, #tpu.memory_space<vmem>>, vector<8x1xf32>
    %54 = vector.broadcast %53 : vector<8x1xf32> to vector<8x256xf32>
    %55 = arith.addf %52, %54 : vector<8x256xf32>
    %cst_45 = arith.constant 0.000000e+00 : f32
    %56 = vector.broadcast %cst_45 : f32 to vector<8x256xf32>
    %57 = arith.cmpf ogt, %55, %56 : vector<8x256xf32>
    %cst_46 = arith.constant 0.00999999977 : f32
    %58 = vector.broadcast %cst_46 : f32 to vector<8x256xf32>
    %59 = arith.mulf %58, %55 : vector<8x256xf32>
    %60 = arith.select %57, %55, %59 : vector<8x256xi1>, vector<8x256xf32>
    %c0_47 = arith.constant 0 : index
    %c0_48 = arith.constant 0 : index
    %c3_49 = arith.constant 3 : index
    %c0_50 = arith.constant 0 : index
    %61 = vector.load %arg5[%c0_47, %c0_48, %c3_49, %c0_50] : memref<1x8x8x256xf32, #tpu.memory_space<vmem>>, vector<1x8x1x256xf32>
    %62 = vector.shape_cast %61 : vector<1x8x1x256xf32> to vector<8x256xf32>
    %63 = vector.shape_cast %60 : vector<8x256xf32> to vector<1x8x1x256xf32>
    tpu.vector_store %arg5[%c0_47, %c0_48, %c3_49, %c0_50], %63 {strides = array<i32>} : memref<1x8x8x256xf32, #tpu.memory_space<vmem>>, vector<1x8x1x256xf32>,
    %c0_51 = arith.constant 0 : index
    %c4 = arith.constant 4 : index
    %c0_52 = arith.constant 0 : index
    %c0_53 = arith.constant 0 : index
    %64 = vector.load %arg2[%c0_51, %c4, %c0_52, %c0_53] : memref<1x8x8x256xf32, #tpu.memory_space<vmem>>, vector<1x1x8x256xf32>
    %65 = vector.shape_cast %64 : vector<1x1x8x256xf32> to vector<8x256xf32>
    %c0_54 = arith.constant 0 : index
    %c0_55 = arith.constant 0 : index
    %66 = vector.load %arg3[%c0_54, %c0_55] : memref<8x1xf32, #tpu.memory_space<vmem>>, vector<8x1xf32>
    %67 = vector.broadcast %66 : vector<8x1xf32> to vector<8x256xf32>
    %68 = arith.mulf %65, %67 : vector<8x256xf32>
    %c0_56 = arith.constant 0 : index
    %c0_57 = arith.constant 0 : index
    %69 = vector.load %arg4[%c0_56, %c0_57] : memref<8x1xf32, #tpu.memory_space<vmem>>, vector<8x1xf32>
    %70 = vector.broadcast %69 : vector<8x1xf32> to vector<8x256xf32>
    %71 = arith.addf %68, %70 : vector<8x256xf32>
    %cst_58 = arith.constant 0.000000e+00 : f32
    %72 = vector.broadcast %cst_58 : f32 to vector<8x256xf32>
    %73 = arith.cmpf ogt, %71, %72 : vector<8x256xf32>
    %cst_59 = arith.constant 0.00999999977 : f32
    %74 = vector.broadcast %cst_59 : f32 to vector<8x256xf32>
    %75 = arith.mulf %74, %71 : vector<8x256xf32>
    %76 = arith.select %73, %71, %75 : vector<8x256xi1>, vector<8x256xf32>
    %c0_60 = arith.constant 0 : index
    %c0_61 = arith.constant 0 : index
    %c4_62 = arith.constant 4 : index
    %c0_63 = arith.constant 0 : index
    %77 = vector.load %arg5[%c0_60, %c0_61, %c4_62, %c0_63] : memref<1x8x8x256xf32, #tpu.memory_space<vmem>>, vector<1x8x1x256xf32>
    %78 = vector.shape_cast %77 : vector<1x8x1x256xf32> to vector<8x256xf32>
    %79 = vector.shape_cast %76 : vector<8x256xf32> to vector<1x8x1x256xf32>
    tpu.vector_store %arg5[%c0_60, %c0_61, %c4_62, %c0_63], %79 {strides = array<i32>} : memref<1x8x8x256xf32, #tpu.memory_space<vmem>>, vector<1x8x1x256xf32>,
    %c0_64 = arith.constant 0 : index
    %c5 = arith.constant 5 : index
    %c0_65 = arith.constant 0 : index
    %c0_66 = arith.constant 0 : index
    %80 = vector.load %arg2[%c0_64, %c5, %c0_65, %c0_66] : memref<1x8x8x256xf32, #tpu.memory_space<vmem>>, vector<1x1x8x256xf32>
    %81 = vector.shape_cast %80 : vector<1x1x8x256xf32> to vector<8x256xf32>
    %c0_67 = arith.constant 0 : index
    %c0_68 = arith.constant 0 : index
    %82 = vector.load %arg3[%c0_67, %c0_68] : memref<8x1xf32, #tpu.memory_space<vmem>>, vector<8x1xf32>
    %83 = vector.broadcast %82 : vector<8x1xf32> to vector<8x256xf32>
    %84 = arith.mulf %81, %83 : vector<8x256xf32>
    %c0_69 = arith.constant 0 : index
    %c0_70 = arith.constant 0 : index
    %85 = vector.load %arg4[%c0_69, %c0_70] : memref<8x1xf32, #tpu.memory_space<vmem>>, vector<8x1xf32>
    %86 = vector.broadcast %85 : vector<8x1xf32> to vector<8x256xf32>
    %87 = arith.addf %84, %86 : vector<8x256xf32>
    %cst_71 = arith.constant 0.000000e+00 : f32
    %88 = vector.broadcast %cst_71 : f32 to vector<8x256xf32>
    %89 = arith.cmpf ogt, %87, %88 : vector<8x256xf32>
    %cst_72 = arith.constant 0.00999999977 : f32
    %90 = vector.broadcast %cst_72 : f32 to vector<8x256xf32>
    %91 = arith.mulf %90, %87 : vector<8x256xf32>
    %92 = arith.select %89, %87, %91 : vector<8x256xi1>, vector<8x256xf32>
    %c0_73 = arith.constant 0 : index
    %c0_74 = arith.constant 0 : index
    %c5_75 = arith.constant 5 : index
    %c0_76 = arith.constant 0 : index
    %93 = vector.load %arg5[%c0_73, %c0_74, %c5_75, %c0_76] : memref<1x8x8x256xf32, #tpu.memory_space<vmem>>, vector<1x8x1x256xf32>
    %94 = vector.shape_cast %93 : vector<1x8x1x256xf32> to vector<8x256xf32>
    %95 = vector.shape_cast %92 : vector<8x256xf32> to vector<1x8x1x256xf32>
    tpu.vector_store %arg5[%c0_73, %c0_74, %c5_75, %c0_76], %95 {strides = array<i32>} : memref<1x8x8x256xf32, #tpu.memory_space<vmem>>, vector<1x8x1x256xf32>,
    %c0_77 = arith.constant 0 : index
    %c6 = arith.constant 6 : index
    %c0_78 = arith.constant 0 : index
    %c0_79 = arith.constant 0 : index
    %96 = vector.load %arg2[%c0_77, %c6, %c0_78, %c0_79] : memref<1x8x8x256xf32, #tpu.memory_space<vmem>>, vector<1x1x8x256xf32>
    %97 = vector.shape_cast %96 : vector<1x1x8x256xf32> to vector<8x256xf32>
    %c0_80 = arith.constant 0 : index
    %c0_81 = arith.constant 0 : index
    %98 = vector.load %arg3[%c0_80, %c0_81] : memref<8x1xf32, #tpu.memory_space<vmem>>, vector<8x1xf32>
    %99 = vector.broadcast %98 : vector<8x1xf32> to vector<8x256xf32>
    %100 = arith.mulf %97, %99 : vector<8x256xf32>
    %c0_82 = arith.constant 0 : index
    %c0_83 = arith.constant 0 : index
    %101 = vector.load %arg4[%c0_82, %c0_83] : memref<8x1xf32, #tpu.memory_space<vmem>>, vector<8x1xf32>
    %102 = vector.broadcast %101 : vector<8x1xf32> to vector<8x256xf32>
    %103 = arith.addf %100, %102 : vector<8x256xf32>
    %cst_84 = arith.constant 0.000000e+00 : f32
    %104 = vector.broadcast %cst_84 : f32 to vector<8x256xf32>
    %105 = arith.cmpf ogt, %103, %104 : vector<8x256xf32>
    %cst_85 = arith.constant 0.00999999977 : f32
    %106 = vector.broadcast %cst_85 : f32 to vector<8x256xf32>
    %107 = arith.mulf %106, %103 : vector<8x256xf32>
    %108 = arith.select %105, %103, %107 : vector<8x256xi1>, vector<8x256xf32>
    %c0_86 = arith.constant 0 : index
    %c0_87 = arith.constant 0 : index
    %c6_88 = arith.constant 6 : index
    %c0_89 = arith.constant 0 : index
    %109 = vector.load %arg5[%c0_86, %c0_87, %c6_88, %c0_89] : memref<1x8x8x256xf32, #tpu.memory_space<vmem>>, vector<1x8x1x256xf32>
    %110 = vector.shape_cast %109 : vector<1x8x1x256xf32> to vector<8x256xf32>
    %111 = vector.shape_cast %108 : vector<8x256xf32> to vector<1x8x1x256xf32>
    tpu.vector_store %arg5[%c0_86, %c0_87, %c6_88, %c0_89], %111 {strides = array<i32>} : memref<1x8x8x256xf32, #tpu.memory_space<vmem>>, vector<1x8x1x256xf32>,
    %c0_90 = arith.constant 0 : index
    %c7 = arith.constant 7 : index
    %c0_91 = arith.constant 0 : index
    %c0_92 = arith.constant 0 : index
    %112 = vector.load %arg2[%c0_90, %c7, %c0_91, %c0_92] : memref<1x8x8x256xf32, #tpu.memory_space<vmem>>, vector<1x1x8x256xf32>
    %113 = vector.shape_cast %112 : vector<1x1x8x256xf32> to vector<8x256xf32>
    %c0_93 = arith.constant 0 : index
    %c0_94 = arith.constant 0 : index
    %114 = vector.load %arg3[%c0_93, %c0_94] : memref<8x1xf32, #tpu.memory_space<vmem>>, vector<8x1xf32>
    %115 = vector.broadcast %114 : vector<8x1xf32> to vector<8x256xf32>
    %116 = arith.mulf %113, %115 : vector<8x256xf32>
    %c0_95 = arith.constant 0 : index
    %c0_96 = arith.constant 0 : index
    %117 = vector.load %arg4[%c0_95, %c0_96] : memref<8x1xf32, #tpu.memory_space<vmem>>, vector<8x1xf32>
    %118 = vector.broadcast %117 : vector<8x1xf32> to vector<8x256xf32>
    %119 = arith.addf %116, %118 : vector<8x256xf32>
    %cst_97 = arith.constant 0.000000e+00 : f32
    %120 = vector.broadcast %cst_97 : f32 to vector<8x256xf32>
    %121 = arith.cmpf ogt, %119, %120 : vector<8x256xf32>
    %cst_98 = arith.constant 0.00999999977 : f32
    %122 = vector.broadcast %cst_98 : f32 to vector<8x256xf32>
    %123 = arith.mulf %122, %119 : vector<8x256xf32>
    %124 = arith.select %121, %119, %123 : vector<8x256xi1>, vector<8x256xf32>
    %c0_99 = arith.constant 0 : index
    %c0_100 = arith.constant 0 : index
    %c7_101 = arith.constant 7 : index
    %c0_102 = arith.constant 0 : index
    %125 = vector.load %arg5[%c0_99, %c0_100, %c7_101, %c0_102] : memref<1x8x8x256xf32, #tpu.memory_space<vmem>>, vector<1x8x1x256xf32>
    %126 = vector.shape_cast %125 : vector<1x8x1x256xf32> to vector<8x256xf32>
    %127 = vector.shape_cast %124 : vector<8x256xf32> to vector<1x8x1x256xf32>
    tpu.vector_store %arg5[%c0_99, %c0_100, %c7_101, %c0_102], %127 {strides = array<i32>} : memref<1x8x8x256xf32, #tpu.memory_space<vmem>>, vector<1x8x1x256xf32>,
    return
  }
  func.func @transform_0(%arg0: i32, %arg1: i32) -> (i32, i32, i32, i32) {
    %c0_i32 = arith.constant 0 : i32
    %c0_i32_0 = arith.constant 0 : i32
    %c0_i32_1 = arith.constant 0 : i32
    return %arg0, %arg1, %c0_i32, %c0_i32_0 : i32, i32, i32, i32
  }
  func.func @transform_1(%arg0: i32, %arg1: i32) -> (i32, i32) {
    %c0_i32 = arith.constant 0 : i32
    %c0_i32_0 = arith.constant 0 : i32
    %c0_i32_1 = arith.constant 0 : i32
    return %c0_i32, %c0_i32_0 : i32, i32
  }
  func.func @transform_2(%arg0: i32, %arg1: i32) -> (i32, i32) {
    %c0_i32 = arith.constant 0 : i32
    %c0_i32_0 = arith.constant 0 : i32
    %c0_i32_1 = arith.constant 0 : i32
    return %c0_i32, %c0_i32_0 : i32, i32
  }
  func.func @transform_3(%arg0: i32, %arg1: i32) -> (i32, i32, i32, i32) {
    %c0_i32 = arith.constant 0 : i32
    %c0_i32_0 = arith.constant 0 : i32
    %c0_i32_1 = arith.constant 0 : i32
    return %arg0, %c0_i32, %arg1, %c0_i32_0 : i32, i32, i32, i32
  }
}

</mosaic_0001>

<bundles_post_ra>
// kernel: conv_bn_relu_3d.3
= control target key start
LH: loop header
LB: loop body
LE: loop exit
PB: predicated region body
PF: predicated region fallthrough
CT: control target
= control target key end

     0   :  { %s1077_s12 = smov 0   ;;  %s1079_s13 = smov 0   ;;  %s1411_s0 = inlined_call_operand.vmem [shape: f32[2,8,8,256], index: 0, kind: input, shape index: {}]   ;;  %s1412_s1 = inlined_call_operand.vmem [shape: f32[8,1], index: 1, kind: input, shape index: {}]   ;;  %s1413_s2 = inlined_call_operand.vmem [shape: f32[8,1], index: 2, kind: input, shape index: {}]   ;;  %s1414_s3 = inlined_call_operand.vmem [shape: f32[2,8,8,256], index: 3, kind: output, shape index: {}]  }
   0x1   :  { %s1081_s14 = smov 0  }
   0x2 LB: > { %s25_s15 = sadd.s32 1, %s1050_s13  ;;  %p918_p0 = scmp.ge.s32.totalorder %s1054_s14, 1  ;;  %s1054_s14 = sphi %s1081_s14, %s13_s14   ;;  %s1050_s13 = sphi %s1079_s13, %s1418_s13   ;;  %s1046_s12 = sphi %s1077_s12, %s1417_s12  }
   0x3   : > { %p27_p1 = scmp.ge.s32.totalorder %s25_s15, 2  ;;  %p159_p2 = scmp.lt.s32.totalorder %s1054_s14, 3 }
   0x5   : > { %s1420_s15 = smov (%p27_p1, %s25_s15), 0  ;;  %p160_p3 = pnand %p918_p0, %p159_p2 }
   0x6   : > { %p193_p4 = scmp.lt.s32.totalorder (!%p160_p3), %s1046_s12, 1 }
   0x7   : > { %163 = sbr.rel (%p160_p3) target bundleno = 203 (0xcb), region = 32 }
   0xc   : > { %v375_v0 = vld [vmem:[%s1412_s1] sm:$0xff]  ;;  %v1056_v1 = vmov 0   ;;  %s1422_s12 = smov (!%p193_p4, %s1046_s12), 1  ;;  %v270_v11 = vlaneseq  ;;  %vm239_vm2 = vcmask 1040384   ;;  %vm241_vm3 = vcmask 1041409  }
   0xd   : > { %1031 = vset.pattern.permute.xlu2 %v1056_v1  ;;  %1030 = vset.pattern.permute.xlu1 %v1056_v1  ;;  %v383_v2 = vld [vmem:[%s1413_s2] sm:$0xff]  ;;  %s1002_s20 = sshll.u32 %s1422_s12, 7  ;;  %vm244_vm4 = vcmask 1042434   ;;  %vm247_vm5 = vcmask 1043459   ;;  %vm250_vm6 = vcmask 1044484   ;;  %vm253_vm8 = vcmask 1045509  }
   0xe   : > { %1029 = vset.pattern.permute.xlu0 %v1056_v1  ;;  %378 = vperm.xlu2 %1031, %v375_v0   ;;  %s1108_s23 = scalar_lea.vmem %s1411_s0, %s1002_s20  ;;  %s1115_s26 = scalar_lea.vmem %s1414_s3, %s1002_s20  ;;  %vm1117_vm7 = vcmp.lt.s32.totalorder %v270_v11, 256  ;;  %vm256_vm9 = vcmask 1046534   ;;  %vm259_vm10 = vcmask 1046528  }
   0xf   : > { %303 = vperm.xlu1 %1030, %v375_v0   ;;  %217 = vperm.xlu0 %1029, %v375_v0   ;;  %v940_v4 = vld [vmem:[%s1108_s23 + $0x20] sm:$0xff]  ;;  %v941_v5 = vld [vmem:[%s1108_s23 + $0x28] sm:$0xff]  ;;  %v930_v35 = vld [vmem:[%s1108_s23 + $0x10] sm:$0xff] }
  0x10   : > { %v931_v36 = vld [vmem:[%s1108_s23 + $0x18] sm:$0xff]  ;;  %v213_v37 = vld [vmem:[%s1108_s23 + $0x8] sm:$0xff]  ;;  %v212_v41 = vld [vmem:[%s1108_s23] sm:$0xff] }
  0x16   : > { %386 = vperm.xlu2 %1031, %v383_v2  }
  0x17   : > { %311 = vperm.xlu1 %1030, %v383_v2   ;;  %225 = vperm.xlu0 %1029, %v383_v2  }
  0x1e   : > { %528 = vperm.xlu2 %1031, %v375_v0  }
  0x1f   : > { %461 = vperm.xlu1 %1030, %v383_v2   ;;  %453 = vperm.xlu0 %1029, %v375_v0  }
  0x26   : > { %753 = vperm.xlu2 %1031, %v375_v0  }
  0x27   : > { %678 = vperm.xlu1 %1030, %v375_v0   ;;  %603 = vperm.xlu0 %1029, %v375_v0  }
  0x2e   : > { %686 = vperm.xlu2 %1031, %v383_v2  }
  0x2f   : > { %611 = vperm.xlu1 %1030, %v383_v2   ;;  %536 = vperm.xlu0 %1029, %v383_v2  }
  0x37   : > { %761 = vperm.xlu0 %1029, %v383_v2  }
  0x68   : > { %v379_v3 = vpop.permute.xlu2 %378 }
  0x69   : > { %v381_v6 = vmul.f32 %v940_v4, %v379_v3  ;;  %v382_v7 = vmul.f32 %v941_v5, %v379_v3 }
  0x70   : > { %v387_v8 = vpop.permute.xlu2 %386 }
  0x71   : > { %v389_v9 = vadd.f32 %v387_v8, %v381_v6  ;;  %v390_v10 = vadd.f32 %v387_v8, %v382_v7 }
  0x73   : > { %vm391_vm0 = vcmp.gt.f32.partialorder %v389_v9, 0.0  ;;  %vm392_vm1 = vcmp.gt.f32.partialorder %v390_v10, 0.0  ;;  %v393_v12 = vmul.f32 0.01, %v389_v9  ;;  %v394_v13 = vmul.f32 0.01, %v390_v10 }
  0x75   : > { %v395_v14 = vsel %vm391_vm0, %v389_v9, %v393_v12  ;;  %v396_v15 = vsel %vm392_vm1, %v390_v10, %v394_v13 }
  0x76   : > { %v399_v17 = vrot.slane %v396_v15, 7  ;;  %v951_v15 = vld [vmem:[%s1108_s23 + $0x38] sm:$0xff] }
  0x78   : > { %v400_v18 = vsel %vm239_vm2, %v395_v14, %v399_v17  ;;  %v401_v19 = vsel %vm241_vm3, %v395_v14, %v399_v17  ;;  %v403_v20 = vsel %vm244_vm4, %v395_v14, %v399_v17  ;;  %v405_v21 = vsel %vm247_vm5, %v395_v14, %v399_v17  ;;  %v1156_v38 = vpop.permute.xlu2 %528 }
  0x79   : > { %v402_v22 = vrot.slane %v401_v19, 1  ;;  %v404_v23 = vrot.slane %v403_v20, 2  ;;  %v406_v24 = vrot.slane %v405_v21, 3  ;;  %v407_v25 = vsel %vm250_vm6, %v395_v14, %v399_v17  ;;  %942 = vst.msk [vmem:[%s1115_s26 + $0x2] ss:$8 sm:$0x3] %vm1117_vm7, %v400_v18 }
  0x7a   : > { %v408_v26 = vrot.slane %v407_v25, 4  ;;  %v409_v27 = vsel %vm253_vm8, %v395_v14, %v399_v17  ;;  %v411_v28 = vsel %vm256_vm9, %v395_v14, %v399_v17  ;;  %v413_v29 = vsel %vm259_vm10, %v399_v17, %v395_v14  ;;  %v950_v14 = vld [vmem:[%s1108_s23 + $0x30] sm:$0xff]  ;;  %v980_v21 = vld [vmem:[%s1108_s23 + $0x60] sm:$0xff] }
  0x7b   : > { %v410_v30 = vrot.slane %v409_v27, 5  ;;  %943 = vst.msk [vmem:[%s1115_s26 + $0x12] ss:$8 sm:$0x3] %vm1117_vm7, %v402_v22  ;;  %v412_v31 = vrot.slane %v411_v28, 6  ;;  %v414_v32 = vrot.slane %v413_v29, 7 }
  0x7c   : > { %944 = vst.msk [vmem:[%s1115_s26 + $0x22] ss:$8 sm:$0x3] %vm1117_vm7, %v404_v23  ;;  %v981_v22 = vld [vmem:[%s1108_s23 + $0x68] sm:$0xff] }
  0x7d   : > { %945 = vst.msk [vmem:[%s1115_s26 + $0x32] ss:$8 sm:$0x3] %vm1117_vm7, %v406_v24 }
  0x7e   : > { %946 = vst.msk [vmem:[%s1115_s26 + $0x42] ss:$8 sm:$0x3] %vm1117_vm7, %v408_v26 }
  0x7f   : > { %947 = vst.msk [vmem:[%s1115_s26 + $0x52] ss:$8 sm:$0x3] %vm1117_vm7, %v410_v30 }
  0x80   : > { %948 = vst.msk [vmem:[%s1115_s26 + $0x62] ss:$8 sm:$0x3] %vm1117_vm7, %v412_v31  ;;  %v1159_v56 = vpop.permute.xlu2 %753 }
  0x81   : > { %949 = vst.msk [vmem:[%s1115_s26 + $0x72] ss:$8 sm:$0x3] %vm1117_vm7, %v414_v32  ;;  %v304_v33 = vpop.permute.xlu1 %303  ;;  %v218_v34 = vpop.permute.xlu0 %217 }
  0x82   : > { %v306_v39 = vmul.f32 %v930_v35, %v304_v33  ;;  %v307_v40 = vmul.f32 %v931_v36, %v304_v33  ;;  %v221_v42 = vmul.f32 %v218_v34, %v213_v37  ;;  %v220_v45 = vmul.f32 %v218_v34, %v212_v41 }
  0x88   : > { %v687_v37 = vpop.permute.xlu2 %686 }
  0x89   : > { %v312_v43 = vpop.permute.xlu1 %311  ;;  %v226_v44 = vpop.permute.xlu0 %225 }
  0x8a   : > { %v314_v46 = vadd.f32 %v312_v43, %v306_v39  ;;  %v315_v47 = vadd.f32 %v312_v43, %v307_v40  ;;  %v229_v48 = vadd.f32 %v226_v44, %v221_v42  ;;  %v228_v51 = vadd.f32 %v226_v44, %v220_v45  ;;  %v971_v44 = vld [vmem:[%s1108_s23 + $0x58] sm:$0xff] }
  0x8c   : > { %vm317_vm11 = vcmp.gt.f32.partialorder %v315_v47, 0.0  ;;  %v318_v49 = vmul.f32 0.01, %v314_v46  ;;  %v319_v50 = vmul.f32 0.01, %v315_v47  ;;  %vm316_vm12 = vcmp.gt.f32.partialorder %v314_v46, 0.0 }
  0x8d   : > { %vm231_vm13 = vcmp.gt.f32.partialorder %v229_v48, 0.0  ;;  %v233_v52 = vmul.f32 0.01, %v229_v48  ;;  %vm230_vm14 = vcmp.gt.f32.partialorder %v228_v51, 0.0  ;;  %v232_v58 = vmul.f32 0.01, %v228_v51 }
  0x8e   : > { %v321_v53 = vsel %vm317_vm11, %v315_v47, %v319_v50  ;;  %v320_v57 = vsel %vm316_vm12, %v314_v46, %v318_v49 }
  0x8f   : > { %v324_v54 = vrot.slane %v321_v53, 7  ;;  %v235_v55 = vsel %vm231_vm13, %v229_v48, %v233_v52  ;;  %v234_v11 = vsel %vm230_vm14, %v228_v51, %v232_v58 }
  0x90   : > { %v238_v59 = vrot.slane %v235_v55, 7 }
  0x91   : > { %v325_v60 = vsel %vm239_vm2, %v320_v57, %v324_v54  ;;  %v326_v61 = vsel %vm241_vm3, %v320_v57, %v324_v54  ;;  %v328_v62 = vsel %vm244_vm4, %v320_v57, %v324_v54  ;;  %v330_v63 = vsel %vm247_vm5, %v320_v57, %v324_v54  ;;  %v462_v0 = vpop.permute.xlu1 %461  ;;  %v454_v1 = vpop.permute.xlu0 %453 }
  0x92   : > { %v327_v2 = vrot.slane %v326_v61, 1  ;;  %v329_v3 = vrot.slane %v328_v62, 2  ;;  %v331_v4 = vrot.slane %v330_v63, 3  ;;  %v332_v5 = vsel %vm250_vm6, %v320_v57, %v324_v54  ;;  %932 = vst.msk [vmem:[%s1115_s26 + $0x1] ss:$8 sm:$0x3] %vm1117_vm7, %v325_v60 }
  0x93   : > { %v333_v6 = vrot.slane %v332_v5, 4  ;;  %v334_v7 = vsel %vm253_vm8, %v320_v57, %v324_v54  ;;  %v336_v8 = vsel %vm256_vm9, %v320_v57, %v324_v54  ;;  %v338_v9 = vsel %vm259_vm10, %v324_v54, %v320_v57  ;;  %v970_v61 = vld [vmem:[%s1108_s23 + $0x50] sm:$0xff] }
  0x94   : > { %v335_v10 = vrot.slane %v334_v7, 5  ;;  %933 = vst.msk [vmem:[%s1115_s26 + $0x11] ss:$8 sm:$0x3] %vm1117_vm7, %v327_v2  ;;  %v337_v12 = vrot.slane %v336_v8, 6  ;;  %v242_v13 = vsel %vm241_vm3, %v234_v11, %v238_v59  ;;  %v339_v17 = vrot.slane %v338_v9, 7 }
  0x95   : > { %934 = vst.msk [vmem:[%s1115_s26 + $0x21] ss:$8 sm:$0x3] %vm1117_vm7, %v329_v3  ;;  %v245_v18 = vsel %vm244_vm4, %v234_v11, %v238_v59  ;;  %v248_v19 = vsel %vm247_vm5, %v234_v11, %v238_v59  ;;  %v240_v20 = vsel %vm239_vm2, %v234_v11, %v238_v59  ;;  %v243_v23 = vrot.slane %v242_v13, 1  ;;  %v961_v8 = vld [vmem:[%s1108_s23 + $0x48] sm:$0xff] }
  0x96   : > { %935 = vst.msk [vmem:[%s1115_s26 + $0x31] ss:$8 sm:$0x3] %vm1117_vm7, %v331_v4  ;;  %v251_v24 = vsel %vm250_vm6, %v234_v11, %v238_v59  ;;  %v456_v25 = vmul.f32 %v950_v14, %v454_v1  ;;  %v457_v26 = vmul.f32 %v951_v15, %v454_v1  ;;  %v246_v27 = vrot.slane %v245_v18, 2 }
  0x97   : > { %936 = vst.msk [vmem:[%s1115_s26 + $0x41] ss:$8 sm:$0x3] %vm1117_vm7, %v333_v6  ;;  %v249_v28 = vrot.slane %v248_v19, 3  ;;  %v254_v29 = vsel %vm253_vm8, %v234_v11, %v238_v59  ;;  %v257_v30 = vsel %vm256_vm9, %v234_v11, %v238_v59  ;;  %v252_v39 = vrot.slane %v251_v24, 4 }
  0x98   : > { %937 = vst.msk [vmem:[%s1115_s26 + $0x51] ss:$8 sm:$0x3] %vm1117_vm7, %v335_v10  ;;  %v464_v32 = vadd.f32 %v462_v0, %v456_v25  ;;  %v465_v33 = vadd.f32 %v462_v0, %v457_v26  ;;  %v260_v40 = vsel %vm259_vm10, %v238_v59, %v234_v11  ;;  %v255_v41 = vrot.slane %v254_v29, 5  ;;  %v960_v11 = vld [vmem:[%s1108_s23 + $0x40] sm:$0xff] }
  0x99   : > { %938 = vst.msk [vmem:[%s1115_s26 + $0x61] ss:$8 sm:$0x3] %vm1117_vm7, %v337_v12  ;;  %v679_v31 = vpop.permute.xlu1 %678  ;;  %v604_v36 = vpop.permute.xlu0 %603  ;;  %v258_v42 = vrot.slane %v257_v30, 6  ;;  %v261_v46 = vrot.slane %v260_v40, 7  ;;  %v532_v19 = vmul.f32 %v961_v8, %v1156_v38 }
  0x9a   : > { %939 = vst.msk [vmem:[%s1115_s26 + $0x71] ss:$8 sm:$0x3] %vm1117_vm7, %v339_v17  ;;  %v681_v34 = vmul.f32 %v980_v21, %v679_v31  ;;  %v682_v35 = vmul.f32 %v981_v22, %v679_v31  ;;  %vm467_vm15 = vcmp.gt.f32.partialorder %v465_v33, 0.0  ;;  %v468_v45 = vmul.f32 0.01, %v464_v32 }
  0x9b   : > { %274 = vst.msk [vmem:[%s1115_s26] ss:$8 sm:$0x3] %vm1117_vm7, %v240_v20  ;;  %v469_v47 = vmul.f32 0.01, %v465_v33  ;;  %vm466_vm0 = vcmp.gt.f32.partialorder %v464_v32, 0.0  ;;  %v607_v52 = vmul.f32 %v971_v44, %v604_v36  ;;  %v606_v10 = vmul.f32 %v970_v61, %v604_v36 }
  0x9c   : > { %923 = vst.msk [vmem:[%s1115_s26 + $0x10] ss:$8 sm:$0x3] %vm1117_vm7, %v243_v23  ;;  %v690_v43 = vadd.f32 %v687_v37, %v682_v35  ;;  %v689_v48 = vadd.f32 %v687_v37, %v681_v34  ;;  %v470_v53 = vsel %vm466_vm0, %v464_v32, %v468_v45  ;;  %v531_v23 = vmul.f32 %v960_v11, %v1156_v38  ;;  %v990_v37 = vld [vmem:[%s1108_s23 + $0x70] sm:$0xff] }
  0x9d   : > { %924 = vst.msk [vmem:[%s1115_s26 + $0x20] ss:$8 sm:$0x3] %vm1117_vm7, %v246_v27  ;;  %v471_v49 = vsel %vm467_vm15, %v465_v33, %v469_v47  ;;  %v991_v27 = vld [vmem:[%s1108_s23 + $0x78] sm:$0xff]  ;;  %v756_v47 = vmul.f32 %v990_v37, %v1159_v56 }
  0x9e   : > { %925 = vst.msk [vmem:[%s1115_s26 + $0x30] ss:$8 sm:$0x3] %vm1117_vm7, %v249_v28  ;;  %vm692_vm1 = vcmp.gt.f32.partialorder %v690_v43, 0.0  ;;  %v694_v50 = vmul.f32 0.01, %v690_v43 }
  0x9f   : > { %926 = vst.msk [vmem:[%s1115_s26 + $0x40] ss:$8 sm:$0x3] %vm1117_vm7, %v252_v39  ;;  %v474_v51 = vrot.slane %v471_v49, 7  ;;  %vm691_vm11 = vcmp.gt.f32.partialorder %v689_v48, 0.0 }
  0xa0   : > { %927 = vst.msk [vmem:[%s1115_s26 + $0x50] ss:$8 sm:$0x3] %vm1117_vm7, %v255_v41  ;;  %v693_v54 = vmul.f32 0.01, %v689_v48  ;;  %v696_v55 = vsel %vm692_vm1, %v690_v43, %v694_v50  ;;  %v757_v41 = vmul.f32 %v991_v27, %v1159_v56 }
  0xa1   : > { %928 = vst.msk [vmem:[%s1115_s26 + $0x60] ss:$8 sm:$0x3] %vm1117_vm7, %v258_v42  ;;  %v475_v57 = vsel %vm239_vm2, %v470_v53, %v474_v51  ;;  %v476_v58 = vsel %vm241_vm3, %v470_v53, %v474_v51  ;;  %v478_v59 = vsel %vm244_vm4, %v470_v53, %v474_v51  ;;  %v480_v60 = vsel %vm247_vm5, %v470_v53, %v474_v51  ;;  %v612_v2 = vpop.permute.xlu1 %611  ;;  %v537_v3 = vpop.permute.xlu0 %536 }
  0xa2   : > { %929 = vst.msk [vmem:[%s1115_s26 + $0x70] ss:$8 sm:$0x3] %vm1117_vm7, %v261_v46  ;;  %v477_v62 = vrot.slane %v476_v58, 1  ;;  %v479_v63 = vrot.slane %v478_v59, 2  ;;  %v481_v0 = vrot.slane %v480_v60, 3  ;;  %v482_v1 = vsel %vm250_vm6, %v470_v53, %v474_v51 }
  0xa3   : > { %952 = vst.msk [vmem:[%s1115_s26 + $0x3] ss:$8 sm:$0x3] %vm1117_vm7, %v475_v57  ;;  %v483_v4 = vrot.slane %v482_v1, 4  ;;  %v484_v5 = vsel %vm253_vm8, %v470_v53, %v474_v51  ;;  %v486_v6 = vsel %vm256_vm9, %v470_v53, %v474_v51  ;;  %v488_v7 = vsel %vm259_vm10, %v474_v51, %v470_v53 }
  0xa4   : > { %v485_v9 = vrot.slane %v484_v5, 5  ;;  %953 = vst.msk [vmem:[%s1115_s26 + $0x13] ss:$8 sm:$0x3] %vm1117_vm7, %v477_v62  ;;  %v487_v12 = vrot.slane %v486_v6, 6  ;;  %v699_v13 = vrot.slane %v696_v55, 7  ;;  %v615_v14 = vadd.f32 %v612_v2, %v607_v52 }
  0xa5   : > { %954 = vst.msk [vmem:[%s1115_s26 + $0x23] ss:$8 sm:$0x3] %vm1117_vm7, %v479_v63  ;;  %v489_v15 = vrot.slane %v488_v7, 7  ;;  %v695_v17 = vsel %vm691_vm11, %v689_v48, %v693_v54  ;;  %v614_v18 = vadd.f32 %v612_v2, %v606_v10  ;;  %v540_v38 = vadd.f32 %v537_v3, %v532_v19 }
  0xa6   : > { %955 = vst.msk [vmem:[%s1115_s26 + $0x33] ss:$8 sm:$0x3] %vm1117_vm7, %v481_v0  ;;  %v701_v20 = vsel %vm241_vm3, %v695_v17, %v699_v13  ;;  %v703_v21 = vsel %vm244_vm4, %v695_v17, %v699_v13  ;;  %v705_v22 = vsel %vm247_vm5, %v695_v17, %v699_v13  ;;  %v700_v24 = vsel %vm239_vm2, %v695_v17, %v699_v13 }
  0xa7   : > { %956 = vst.msk [vmem:[%s1115_s26 + $0x43] ss:$8 sm:$0x3] %vm1117_vm7, %v483_v4  ;;  %v702_v25 = vrot.slane %v701_v20, 1  ;;  %v707_v26 = vsel %vm250_vm6, %v695_v17, %v699_v13  ;;  %v704_v28 = vrot.slane %v703_v21, 2  ;;  %v709_v29 = vsel %vm253_vm8, %v695_v17, %v699_v13 }
  0xa8   : > { %957 = vst.msk [vmem:[%s1115_s26 + $0x53] ss:$8 sm:$0x3] %vm1117_vm7, %v485_v9  ;;  %vm617_vm12 = vcmp.gt.f32.partialorder %v615_v14, 0.0  ;;  %v706_v30 = vrot.slane %v705_v22, 3  ;;  %v711_v31 = vsel %vm256_vm9, %v695_v17, %v699_v13  ;;  %v708_v33 = vrot.slane %v707_v26, 4 }
  0xa9   : > { %958 = vst.msk [vmem:[%s1115_s26 + $0x63] ss:$8 sm:$0x3] %vm1117_vm7, %v487_v12  ;;  %v618_v32 = vmul.f32 0.01, %v614_v18  ;;  %v713_v34 = vsel %vm259_vm10, %v699_v13, %v695_v17  ;;  %v539_v36 = vadd.f32 %v537_v3, %v531_v23  ;;  %v710_v39 = vrot.slane %v709_v29, 5  ;;  %v762_v40 = vpop.permute.xlu0 %761 }
  0xaa   : > { %959 = vst.msk [vmem:[%s1115_s26 + $0x73] ss:$8 sm:$0x3] %vm1117_vm7, %v489_v15  ;;  %v619_v35 = vmul.f32 0.01, %v615_v14  ;;  %vm616_vm13 = vcmp.gt.f32.partialorder %v614_v18, 0.0  ;;  %v765_v50 = vadd.f32 %v762_v40, %v757_v41  ;;  %v764_v2 = vadd.f32 %v762_v40, %v756_v47 }
  0xab   : > { %982 = vst.msk [vmem:[%s1115_s26 + $0x6] ss:$8 sm:$0x3] %vm1117_vm7, %v700_v24  ;;  %v712_v42 = vrot.slane %v711_v31, 6  ;;  %v544_v44 = vmul.f32 0.01, %v540_v38  ;;  %v620_v48 = vsel %vm616_vm13, %v614_v18, %v618_v32 }
  0xac   : > { %983 = vst.msk [vmem:[%s1115_s26 + $0x16] ss:$8 sm:$0x3] %vm1117_vm7, %v702_v25  ;;  %v621_v43 = vsel %vm617_vm12, %v615_v14, %v619_v35  ;;  %v714_v45 = vrot.slane %v713_v34, 7  ;;  %vm542_vm14 = vcmp.gt.f32.partialorder %v540_v38, 0.0  ;;  %vm541_vm15 = vcmp.gt.f32.partialorder %v539_v36, 0.0 }
  0xad   : > { %984 = vst.msk [vmem:[%s1115_s26 + $0x26] ss:$8 sm:$0x3] %vm1117_vm7, %v704_v28  ;;  %v624_v46 = vrot.slane %v621_v43, 7  ;;  %v543_v49 = vmul.f32 0.01, %v539_v36  ;;  %v546_v58 = vsel %vm542_vm14, %v540_v38, %v544_v44 }
  0xae   : > { %985 = vst.msk [vmem:[%s1115_s26 + $0x36] ss:$8 sm:$0x3] %vm1117_vm7, %v706_v30  ;;  %v549_v1 = vrot.slane %v546_v58, 7  ;;  %v769_v5 = vmul.f32 0.01, %v765_v50 }
  0xaf   : > { %986 = vst.msk [vmem:[%s1115_s26 + $0x46] ss:$8 sm:$0x3] %vm1117_vm7, %v708_v33  ;;  %v625_v51 = vsel %vm239_vm2, %v620_v48, %v624_v46  ;;  %v626_v52 = vsel %vm241_vm3, %v620_v48, %v624_v46  ;;  %v628_v53 = vsel %vm244_vm4, %v620_v48, %v624_v46  ;;  %v630_v54 = vsel %vm247_vm5, %v620_v48, %v624_v46 }
  0xb0   : > { %987 = vst.msk [vmem:[%s1115_s26 + $0x56] ss:$8 sm:$0x3] %vm1117_vm7, %v710_v39  ;;  %v627_v56 = vrot.slane %v626_v52, 1  ;;  %v629_v55 = vrot.slane %v628_v53, 2  ;;  %v632_v57 = vsel %vm250_vm6, %v620_v48, %v624_v46  ;;  %v631_v59 = vrot.slane %v630_v54, 3 }
  0xb1   : > { %988 = vst.msk [vmem:[%s1115_s26 + $0x66] ss:$8 sm:$0x3] %vm1117_vm7, %v712_v42  ;;  %v634_v60 = vsel %vm253_vm8, %v620_v48, %v624_v46  ;;  %v636_v61 = vsel %vm256_vm9, %v620_v48, %v624_v46  ;;  %v633_v62 = vrot.slane %v632_v57, 4  ;;  %v638_v63 = vsel %vm259_vm10, %v624_v46, %v620_v48 }
  0xb2   : > { %989 = vst.msk [vmem:[%s1115_s26 + $0x76] ss:$8 sm:$0x3] %vm1117_vm7, %v714_v45  ;;  %v635_v0 = vrot.slane %v634_v60, 5  ;;  %v637_v3 = vrot.slane %v636_v61, 6  ;;  %v545_v4 = vsel %vm541_vm15, %v539_v36, %v543_v49  ;;  %v639_v6 = vrot.slane %v638_v63, 7 }
  0xb3   : > { %972 = vst.msk [vmem:[%s1115_s26 + $0x5] ss:$8 sm:$0x3] %vm1117_vm7, %v625_v51  ;;  %v551_v7 = vsel %vm241_vm3, %v545_v4, %v549_v1  ;;  %v553_v8 = vsel %vm244_vm4, %v545_v4, %v549_v1  ;;  %vm767_vm0 = vcmp.gt.f32.partialorder %v765_v50, 0.0  ;;  %v555_v9 = vsel %vm247_vm5, %v545_v4, %v549_v1 }
  0xb4   : > { %973 = vst.msk [vmem:[%s1115_s26 + $0x15] ss:$8 sm:$0x3] %vm1117_vm7, %v627_v56  ;;  %v550_v10 = vsel %vm239_vm2, %v545_v4, %v549_v1  ;;  %v552_v11 = vrot.slane %v551_v7, 1  ;;  %v557_v12 = vsel %vm250_vm6, %v545_v4, %v549_v1  ;;  %v768_v13 = vmul.f32 0.01, %v764_v2 }
  0xb5   : > { %974 = vst.msk [vmem:[%s1115_s26 + $0x25] ss:$8 sm:$0x3] %vm1117_vm7, %v629_v55  ;;  %v554_v14 = vrot.slane %v553_v8, 2  ;;  %v559_v15 = vsel %vm253_vm8, %v545_v4, %v549_v1  ;;  %vm766_vm1 = vcmp.gt.f32.partialorder %v764_v2, 0.0  ;;  %v771_v17 = vsel %vm767_vm0, %v765_v50, %v769_v5 }
  0xb6   : > { %975 = vst.msk [vmem:[%s1115_s26 + $0x35] ss:$8 sm:$0x3] %vm1117_vm7, %v631_v59  ;;  %v556_v18 = vrot.slane %v555_v9, 3  ;;  %v561_v19 = vsel %vm256_vm9, %v545_v4, %v549_v1  ;;  %v774_v20 = vrot.slane %v771_v17, 7  ;;  %v558_v21 = vrot.slane %v557_v12, 4 }
  0xb7   : > { %976 = vst.msk [vmem:[%s1115_s26 + $0x45] ss:$8 sm:$0x3] %vm1117_vm7, %v633_v62  ;;  %v563_v22 = vsel %vm259_vm10, %v549_v1, %v545_v4  ;;  %v560_v23 = vrot.slane %v559_v15, 5  ;;  %v770_v24 = vsel %vm766_vm1, %v764_v2, %v768_v13  ;;  %v562_v25 = vrot.slane %v561_v19, 6 }
  0xb8   : > { %977 = vst.msk [vmem:[%s1115_s26 + $0x55] ss:$8 sm:$0x3] %vm1117_vm7, %v635_v0  ;;  %v776_v26 = vsel %vm241_vm3, %v770_v24, %v774_v20  ;;  %v564_v27 = vrot.slane %v563_v22, 7  ;;  %v778_v28 = vsel %vm244_vm4, %v770_v24, %v774_v20  ;;  %v780_v29 = vsel %vm247_vm5, %v770_v24, %v774_v20 }
  0xb9   : > { %978 = vst.msk [vmem:[%s1115_s26 + $0x65] ss:$8 sm:$0x3] %vm1117_vm7, %v637_v3  ;;  %v775_v38 = vsel %vm239_vm2, %v770_v24, %v774_v20  ;;  %v777_v30 = vrot.slane %v776_v26, 1  ;;  %v782_v31 = vsel %vm250_vm6, %v770_v24, %v774_v20  ;;  %v779_v32 = vrot.slane %v778_v28, 2 }
  0xba   : > { %979 = vst.msk [vmem:[%s1115_s26 + $0x75] ss:$8 sm:$0x3] %vm1117_vm7, %v639_v6  ;;  %v784_v33 = vsel %vm253_vm8, %v770_v24, %v774_v20  ;;  %v781_v34 = vrot.slane %v780_v29, 3  ;;  %v786_v35 = vsel %vm256_vm9, %v770_v24, %v774_v20  ;;  %v783_v36 = vrot.slane %v782_v31, 4 }
  0xbb   : > { %962 = vst.msk [vmem:[%s1115_s26 + $0x4] ss:$8 sm:$0x3] %vm1117_vm7, %v550_v10  ;;  %v788_v37 = vsel %vm259_vm10, %v774_v20, %v770_v24  ;;  %v785_v39 = vrot.slane %v784_v33, 5  ;;  %v787_v40 = vrot.slane %v786_v35, 6 }
  0xbc   : > { %963 = vst.msk [vmem:[%s1115_s26 + $0x14] ss:$8 sm:$0x3] %vm1117_vm7, %v552_v11  ;;  %v789_v41 = vrot.slane %v788_v37, 7 }
  0xbd   : > { %964 = vst.msk [vmem:[%s1115_s26 + $0x24] ss:$8 sm:$0x3] %vm1117_vm7, %v554_v14 }
  0xbe   : > { %965 = vst.msk [vmem:[%s1115_s26 + $0x34] ss:$8 sm:$0x3] %vm1117_vm7, %v556_v18 }
  0xbf   : > { %966 = vst.msk [vmem:[%s1115_s26 + $0x44] ss:$8 sm:$0x3] %vm1117_vm7, %v558_v21 }
  0xc0   : > { %967 = vst.msk [vmem:[%s1115_s26 + $0x54] ss:$8 sm:$0x3] %vm1117_vm7, %v560_v23 }
  0xc1   : > { %968 = vst.msk [vmem:[%s1115_s26 + $0x64] ss:$8 sm:$0x3] %vm1117_vm7, %v562_v25 }
  0xc2   : > { %969 = vst.msk [vmem:[%s1115_s26 + $0x74] ss:$8 sm:$0x3] %vm1117_vm7, %v564_v27 }
  0xc3   : > { %992 = vst.msk [vmem:[%s1115_s26 + $0x7] ss:$8 sm:$0x3] %vm1117_vm7, %v775_v38 }
  0xc4   : > { %993 = vst.msk [vmem:[%s1115_s26 + $0x17] ss:$8 sm:$0x3] %vm1117_vm7, %v777_v30 }
  0xc5   : > { %994 = vst.msk [vmem:[%s1115_s26 + $0x27] ss:$8 sm:$0x3] %vm1117_vm7, %v779_v32 }
  0xc6   : > { %995 = vst.msk [vmem:[%s1115_s26 + $0x37] ss:$8 sm:$0x3] %vm1117_vm7, %v781_v34 }
  0xc7   : > { %996 = vst.msk [vmem:[%s1115_s26 + $0x47] ss:$8 sm:$0x3] %vm1117_vm7, %v783_v36 }
  0xc8   : > { %997 = vst.msk [vmem:[%s1115_s26 + $0x57] ss:$8 sm:$0x3] %vm1117_vm7, %v785_v39 }
  0xc9   : > { %998 = vst.msk [vmem:[%s1115_s26 + $0x67] ss:$8 sm:$0x3] %vm1117_vm7, %v787_v40 }
  0xca   : > { %999 = vst.msk [vmem:[%s1115_s26 + $0x77] ss:$8 sm:$0x3] %vm1117_vm7, %v789_v41 }
  0xcb PF: > { %s13_s14 = sadd.s32 1, %s1054_s14   ;;  %s1417_s12 = smov %s1050_s13 }
  0xcc   : > { %p10_p5 = scmp.ge.s32.totalorder %s13_s14, 4   ;;  %s1418_s13 = smov %s1420_s15 }
  0xce   :  { %12 = sbr.rel (!%p10_p5) target bundleno = 2 (0x2), region = 132 }

// kernel: conv_bn_relu_3d.2
= control target key start
LH: loop header
LB: loop body
LE: loop exit
PB: predicated region body
PF: predicated region fallthrough
CT: control target
= control target key end

     0   :  { %s1605_s18 = smov 0   ;;  %s1607_s19 = smov 0   ;;  %s2134_s0 = inlined_call_operand.vmem [shape: f32[2,10,8,290], index: 0, kind: input, shape index: {}]   ;;  %s2135_s1 = inlined_call_operand.vmem [shape: f32[8,216], index: 1, kind: input, shape index: {}]   ;;  %s2136_s2 = inlined_call_operand.vmem [shape: f32[9,256], index: 2, kind: input, shape index: {}]   ;;  %s2137_s3 = inlined_call_operand.vmem [shape: f32[2,8,8,256], index: 3, kind: output, shape index: {0}]   ;;  %s2138_s4 = inlined_call_operand.vmem [shape: f32[2,8,1], index: 4, kind: output, shape index: {1}]   ;;  %s2139_s5 = inlined_call_operand.vmem [shape: f32[2,8,1], index: 5, kind: output, shape index: {2}]  }
   0x1   :  { %s1609_s20 = smov 0   ;;  %s1611_s21 = smov 0  }
   0x2   :  { %s1613_s22 = smov 0  }
   0x3 LB: > { %s25_s23 = sadd.s32 1, %s1550_s20  ;;  %s28_s24 = sadd.s32 1, %s1554_s21  ;;  %s1558_s22 = sphi %s1613_s22, %s16_s22   ;;  %s1554_s21 = sphi %s1611_s21, %s2143_s21   ;;  %s1550_s20 = sphi %s1609_s20, %s2142_s20   ;;  %s1546_s19 = sphi %s1607_s19, %s2141_s19   ;;  %s1542_s18 = sphi %s1605_s18, %s2140_s18  }
   0x4   : > { %p26_p0 = scmp.ge.s32.totalorder %s25_s23, 8  ;;  %p1230_p1 = scmp.ge.s32.totalorder %s1558_s22, 1 }
   0x5   : > { %p206_p2 = scmp.lt.s32.totalorder %s1558_s22, 17 }
   0x6   : > { %s2145_s23 = smov (%p26_p0, %s25_s23), 0  ;;  %s2147_s24 = smov (!%p26_p0, %s28_s24), %s1554_s21 }
   0x7   : > { %p207_p3 = pnand %p1230_p1, %p206_p2  ;;  %p30_p4 = scmp.ge.s32.totalorder %s2147_s24, 2 }
   0x8   : > { %s1560_s29 = smov (!%p207_p3), 32   ;;  %s1561_s7 = smov (!%p207_p3), 18  }
   0x9   : > { %s2149_s24 = smov (%p30_p4, %s2147_s24), 0  ;;  %210 = sbr.rel (%p207_p3) target bundleno = 621 (0x26d), region = 32 }
   0xa   : > { %s1562_s8 = smov (!%p207_p3), 16   ;;  %p246_p5 = scmp.lt.s32.totalorder (!%p207_p3), %s1546_s19, 1 }
   0xb   : > { %s1563_s27 = smov (!%p207_p3), 2   ;;  %s1564_s30 = smov (!%p207_p3), 1  }
   0xc   : > { %s1303_s10 = smul.u32 (!%p207_p3), 24, %s1542_s18  ;;  %s1566_s17 = smov (!%p207_p3), 33  }
   0xd   : > { %s1567_s25 = smov (!%p207_p3), 111   ;;  %s1568_s26 = smov (!%p207_p3), 112  }
   0xe   : > { %v1241_v0 = vld [vmem:[%s2136_s2 + $0x6] ss:$8 sm:$0x3]  ;;  %v1240_v2 = vld [vmem:[%s2136_s2 + $0x5] ss:$8 sm:$0x3] }
   0xf   : > { %v456_v1 = vperm.slane %v1241_v0, 0  ;;  %v422_v3 = vperm.slane %v1240_v2, 0  ;;  %v1239_v4 = vld [vmem:[%s2136_s2 + $0x3] ss:$8 sm:$0x3]  ;;  %v457_v6 = vperm.slane %v1241_v0, 1 }
  0x10   : > { %v369_v5 = vperm.slane %v1239_v4, 0  ;;  %v423_v7 = vperm.slane %v1240_v2, 1  ;;  %s2151_s19 = smov (!%p246_p5, %s1546_s19), 1  ;;  %v370_v8 = vperm.slane %v1239_v4, 1  ;;  %vm375_vm0 = vcmask 130048   ;;  %s1570_s28 = smov 110  }
  0x11   : > { %458 = vrot.lane.b32.xlu0 %v456_v1, %s1560_s29  ;;  %424 = vrot.lane.b32.xlu1 %v422_v3, %s1561_s7  ;;  %s1235_s9 = sshll.u32 %s2151_s19, 3  ;;  %v1238_v9 = vld [vmem:[%s2136_s2 + $0x2] ss:$8 sm:$0x3]  ;;  %s1304_s6 = smul.u32 240, %s2151_s19  ;;  %vm341_vm1 = vcmask 15360  }
  0x12   : > { %371 = vrot.lane.b32.xlu2 %v369_v5, %s1562_s8  ;;  %s1656_s12 = scalar_lea.vmem %s2138_s4, %s1235_s9  ;;  %s1661_s15 = scalar_lea.vmem %s2139_s5, %s1235_s9  ;;  %v335_v10 = vperm.slane %v1238_v9, 0  ;;  %v336_v11 = vperm.slane %v1238_v9, 1  ;;  %v1237_v12 = vld [vmem:[%s2136_s2 + $0x1] ss:$8 sm:$0x3]  ;;  %vm428_vm2 = vcmask 146432  }
  0x13   : > { %v301_v13 = vperm.slane %v1237_v12, 0  ;;  %v1243_v14 = vld [vmem:[%s2136_s2 + $0x10] ss:$8 sm:$0x3]  ;;  %v302_v15 = vperm.slane %v1237_v12, 1  ;;  %s250_s14 = scalar_lea.vmem %s2134_s0, %s1304_s6  ;;  %s1573_s6 = smov 94  }
  0x14   : > { %v524_v16 = vperm.slane %v1243_v14, 0  ;;  %v525_v17 = vperm.slane %v1243_v14, 1  ;;  %v1242_v18 = vld [vmem:[%s2136_s2 + $0x7] ss:$8 sm:$0x3]  ;;  %s285_s16 = scalar_lea.vmem %s250_s14, %s1303_s10  ;;  %vm496_vm3 = vcmask 269312  }
  0x15   : > { %v490_v19 = vperm.slane %v1242_v18, 0  ;;  %v491_v20 = vperm.slane %v1242_v18, 1  ;;  %v1680_v21 = vld [vmem:[%s285_s16 + $0x20] sm:$0xff]  ;;  %v1682_v22 = vld [vmem:[%s285_s16 + $0x28] sm:$0xff]  ;;  %v1686_v24 = vld [vmem:[%s285_s16 + $0x18] sm:$0xff]  ;;  %vm462_vm4 = vcmask 261120  }
  0x16   : > { %v1360_v23 = vpack.i.bf16 %v1682_v22, %v1680_v21  ;;  %v1688_v25 = vld [vmem:[%s285_s16 + $0x38] sm:$0xff]  ;;  %v1692_v27 = vld [vmem:[%s285_s16 + $0x8] sm:$0xff]  ;;  %v1694_v28 = vld [vmem:[%s285_s16 + $0x40] sm:$0xff]  ;;  %vm307_vm5 = vcmask 7168   ;;  %vm530_vm6 = vcmask 277504   ;;  %vm411_vm7 = vcmask 908288  }
  0x17   : > { %v1365_v26 = vpack.i.bf16 %v1688_v25, %v1686_v24  ;;  %v1370_v29 = vpack.i.bf16 %v1692_v27, %v1694_v28  ;;  %v1698_v30 = vld [vmem:[%s285_s16] sm:$0xff]  ;;  %v1703_v32 = vld [vmem:[%s285_s16 + $0x30] sm:$0xff]  ;;  %vm479_vm8 = vcmask 785408   ;;  %vm445_vm9 = vcmask 900096   ;;  %p253_p6 = scmp.lt.s32.totalorder %s1542_s18, 7  ;;  %p1299_p7 = scmp.ne.s32.totalorder %s1542_s18, 0 }
  0x18   : > { %v1705_v33 = vld [vmem:[%s285_s16 + $0x10] sm:$0xff]  ;;  %vm392_vm10 = vcmask 916480   ;;  %vm358_vm11 = vcmask 1031168   ;;  %vm324_vm12 = vcmask 1039360   ;;  %vm547_vm13 = vcmask 769024  }
  0x19   : > { %460 = vrot.lane.b32.xlu0 %v457_v6, %s1560_s29  ;;  %426 = vrot.lane.b32.xlu1 %v423_v7, %s1561_s7  ;;  %s1565_s7 = smov 34   ;;  %v1375_v41 = vpack.i.bf16 %v1703_v32, %v1705_v33  ;;  %s1571_s29 = smov 126   ;;  %vm513_vm14 = vcmask 777216   ;;  %vm960_vm15 = vcmask 719872  }
  0x1a   : > { %373 = vrot.lane.b32.xlu2 %v370_v8, %s1562_s8  ;;  %s254_s16 = scalar_select %p253_p6, %s1542_s18, 7 }
  0x21   : > { %337 = vrot.lane.b32.xlu0 %v335_v10, %s1563_s27  ;;  %339 = vrot.lane.b32.xlu1 %v336_v11, %s1563_s27  ;;  %s1569_s27 = smov 96  }
  0x22   : > { %303 = vrot.lane.b32.xlu2 %v301_v13, %s1564_s30 }
  0x29   : > { %305 = vrot.lane.b32.xlu0 %v302_v15, %s1564_s30  ;;  %526 = vrot.lane.b32.xlu1 %v524_v16, %s1565_s7  ;;  %s1572_s30 = smov 127  }
  0x2a   : > { %528 = vrot.lane.b32.xlu2 %v525_v17, %s1565_s7  ;;  %s1574_s7 = smov 95  }
  0x31   : > { %492 = vrot.lane.b32.xlu0 %v490_v19, %s1566_s17  ;;  %494 = vrot.lane.b32.xlu1 %v491_v20, %s1566_s17  ;;  %s1232_s17 = sshll.u32 %s254_s16, 1 }
  0x32   : > { %1376 = vrot.lane.b32.xlu2 %v1375_v41, %s1567_s25 }
  0x39   : > { %1361 = vrot.lane.b32.xlu1 %v1360_v23, %s1567_s25 }
  0x41   : > { %1366 = vrot.lane.b32.xlu1 %v1365_v26, %s1567_s25 }
  0x49   : > { %1371 = vrot.lane.b32.xlu1 %v1370_v29, %s1567_s25 }
  0x51   : > { %405 = vrot.lane.b32.xlu1 %v1698_v30, %s1567_s25  ;;  %s1233_s25 = sshll.u32 %s2151_s19, 4 }
  0x6c   : > { %v1701_v31 = vpop.permute.xlu2 %371 }
  0x6d   : > { %v784_v34 = vmul.f32 %v1703_v32, %v1701_v31  ;;  %v1711_v35 = vmul.f32 %v1686_v24, %v1701_v31 }
  0x74   : > { %v374_v36 = vpop.permute.xlu2 %373 }
  0x75   : > { %v376_v37 = vsel %vm375_vm0, %v1701_v31, %v374_v36  ;;  %v382_v38 = vmul.f32 %v374_v36, %v1705_v33  ;;  %v1716_v39 = vmul.f32 %v1682_v22, %v374_v36  ;;  %v1719_v40 = vmul.f32 %v1694_v28, %v374_v36 }
  0x76   : > { %v1724_v42 = vmul.f32 %v1688_v25, %v376_v37  ;;  %v1727_v43 = vmul.f32 %v1692_v27, %v376_v37  ;;  %v1730_v44 = vmul.f32 %v1680_v21, %v376_v37 }
  0x77   : > { %v1400_v45 = vpack.i.bf16 %v784_v34, %v382_v38 }
  0x78   : > { %v1455_v46 = vpack.i.bf16 %v1724_v42, %v1711_v35  ;;  %v1495_v47 = vpack.i.bf16 %v1727_v43, %v1719_v40  ;;  %v1425_v48 = vpack.i.bf16 %v1716_v39, %v1730_v44 }
  0x79   : > { %1401 = vrot.lane.b32.xlu1 %v1400_v45, %s1568_s26 }
  0x7c   : > { %v1764_v0 = vpop.permute.xlu2 %303 }
  0x7d   : > { %v742_v2 = vmul.f32 %v1703_v32, %v1764_v0  ;;  %v567_v40 = vmul.f32 %v1686_v24, %v1764_v0 }
  0x83   : > { %v1739_v49 = vpop.permute.xlu0 %458  ;;  %v1741_v50 = vpop.permute.xlu1 %424 }
  0x84   : > { %v844_v52 = vmul.f32 %v1703_v32, %v1739_v49  ;;  %v823_v56 = vmul.f32 %v1703_v32, %v1741_v50  ;;  %v669_v45 = vmul.f32 %v1686_v24, %v1739_v49 }
  0x8b   : > { %v1743_v51 = vpop.permute.xlu0 %460  ;;  %v1749_v54 = vpop.permute.xlu1 %426 }
  0x8c   : > { %v469_v53 = vmul.f32 %v1743_v51, %v1705_v33  ;;  %v435_v57 = vmul.f32 %v1749_v54, %v1705_v33  ;;  %v1790_v11 = vsel %vm428_vm2, %v1741_v50, %v1749_v54  ;;  %v650_v14 = vmul.f32 %v1682_v22, %v1749_v54 }
  0x8d   : > { %v649_v15 = vmul.f32 %v1680_v21, %v1790_v11  ;;  %v463_v37 = vsel %vm462_vm4, %v1739_v49, %v1743_v51 }
  0x8e   : > { %v1385_v55 = vpack.i.bf16 %v844_v52, %v469_v53  ;;  %v1395_v62 = vpack.i.bf16 %v823_v56, %v435_v57  ;;  %v845_v41 = vmul.f32 %v1688_v25, %v463_v37  ;;  %v846_v52 = vmul.f32 %v1694_v28, %v1743_v51 }
  0x8f   : > { %v1420_v34 = vpack.i.bf16 %v650_v14, %v649_v15  ;;  %v468_v53 = vmul.f32 %v463_v37, %v1692_v27  ;;  %v467_v57 = vmul.f32 %v1739_v49, %v1698_v30  ;;  %v433_v49 = vmul.f32 %v1741_v50, %v1698_v30  ;;  %v529_v14 = vpop.permute.xlu2 %528 }
  0x90   : > { %1386 = vrot.lane.b32.xlu0 %v1385_v55, %s1569_s27  ;;  %v1430_v55 = vpack.i.bf16 %v845_v41, %v669_v45 }
  0x93   : > { %v1756_v58 = vpop.permute.xlu0 %337  ;;  %v1758_v59 = vpop.permute.xlu1 %339 }
  0x94   : > { %v763_v60 = vmul.f32 %v1703_v32, %v1756_v58  ;;  %v348_v61 = vmul.f32 %v1705_v33, %v1758_v59  ;;  %v1768_v1 = vsel %vm341_vm1, %v1756_v58, %v1758_v59  ;;  %v590_v3 = vmul.f32 %v1682_v22, %v1758_v59 }
  0x95   : > { %v589_v5 = vmul.f32 %v1680_v21, %v1768_v1 }
  0x96   : > { %v1405_v63 = vpack.i.bf16 %v763_v60, %v348_v61  ;;  %v1475_v60 = vpack.i.bf16 %v468_v53, %v846_v52 }
  0x97   : > { %v1435_v13 = vpack.i.bf16 %v590_v3, %v589_v5 }
  0x98   : > { %1396 = vrot.lane.b32.xlu0 %v1395_v62, %s1570_s28  ;;  %1406 = vrot.lane.b32.xlu1 %v1405_v63, %s1571_s29  ;;  %v825_v63 = vmul.f32 %v1694_v28, %v1749_v54 }
  0x9b   : > { %v1776_v4 = vpop.permute.xlu0 %305  ;;  %v1780_v6 = vpop.permute.xlu1 %526 }
  0x9c   : > { %v314_v7 = vmul.f32 %v1705_v33, %v1776_v4  ;;  %v535_v8 = vmul.f32 %v1780_v6, %v1698_v30  ;;  %v886_v9 = vmul.f32 %v1703_v32, %v1780_v6  ;;  %v308_v56 = vsel %vm307_vm5, %v1764_v0, %v1776_v4 }
  0x9d   : > { %v569_v61 = vmul.f32 %v1682_v22, %v1776_v4  ;;  %v568_v62 = vmul.f32 %v1680_v21, %v308_v56  ;;  %v743_v43 = vmul.f32 %v1688_v25, %v308_v56  ;;  %v531_v39 = vsel %vm530_vm6, %v1780_v6, %v529_v14 }
  0x9e   : > { %v1410_v10 = vpack.i.bf16 %v742_v2, %v314_v7  ;;  %v1380_v12 = vpack.i.bf16 %v535_v8, %v886_v9  ;;  %v434_v2 = vmul.f32 %v1790_v11, %v1692_v27  ;;  %v671_v7 = vmul.f32 %v1682_v22, %v1743_v51 }
  0x9f   : > { %v1445_v3 = vpack.i.bf16 %v569_v61, %v568_v62  ;;  %v670_v8 = vmul.f32 %v1680_v21, %v463_v37  ;;  %v588_v9 = vmul.f32 %v1686_v24, %v1756_v58  ;;  %v764_v51 = vmul.f32 %v1688_v25, %v1768_v1 }
  0xa0   : > { %1411 = vrot.lane.b32.xlu0 %v1410_v10, %s1572_s30  ;;  %1381 = vrot.lane.b32.xlu2 %v1380_v12, %s1573_s6  ;;  %v1490_v5 = vpack.i.bf16 %v434_v2, %v825_v63  ;;  %v1485_v15 = vpack.i.bf16 %v743_v43, %v567_v40  ;;  %v711_v44 = vmul.f32 %v1686_v24, %v1780_v6 }
  0xa1   : > { %1436 = vrot.lane.b32.xlu1 %v1435_v13, %s1571_s29  ;;  %v1415_v54 = vpack.i.bf16 %v671_v7, %v670_v8  ;;  %v1470_v35 = vpack.i.bf16 %v764_v51, %v588_v9  ;;  %v824_v13 = vmul.f32 %v1688_v25, %v1790_v11  ;;  %v313_v6 = vmul.f32 %v1692_v27, %v308_v56 }
  0xa2   : > { %v380_v56 = vmul.f32 %v1698_v30, %v1701_v31  ;;  %v712_v61 = vmul.f32 %v1680_v21, %v531_v39  ;;  %v312_v62 = vmul.f32 %v1698_v30, %v1764_v0  ;;  %v346_v31 = vmul.f32 %v1698_v30, %v1756_v58 }
  0xa3   : > { %v1799_v16 = vpop.permute.xlu0 %492  ;;  %v495_v17 = vpop.permute.xlu1 %494 }
  0xa4   : > { %v501_v18 = vmul.f32 %v1799_v16, %v1698_v30  ;;  %v865_v19 = vmul.f32 %v1703_v32, %v1799_v16  ;;  %v1806_v20 = vmul.f32 %v495_v17, %v1705_v33  ;;  %v867_v23 = vmul.f32 %v1694_v28, %v495_v17 }
  0xa5   : > { %v1810_v26 = vsel %vm496_vm3, %v1799_v16, %v495_v17  ;;  %v692_v10 = vmul.f32 %v1682_v22, %v495_v17  ;;  %v690_v2 = vmul.f32 %v1686_v24, %v1799_v16 }
  0xa6   : > { %v1390_v29 = vpack.i.bf16 %v501_v18, %v865_v19  ;;  %v866_v36 = vmul.f32 %v1688_v25, %v1810_v26  ;;  %v691_v12 = vmul.f32 %v1680_v21, %v1810_v26  ;;  %v888_v18 = vmul.f32 %v1694_v28, %v529_v14 }
  0xa7   : > { %v887_v19 = vmul.f32 %v1688_v25, %v531_v39 }
  0xa8   : > { %1421 = vrot.lane.b32.xlu0 %v1420_v34, %s1570_s28  ;;  %v1460_v38 = vpack.i.bf16 %v867_v23, %v866_v36  ;;  %1391 = vrot.lane.b32.xlu2 %v1390_v29, %s1574_s7  ;;  %v1515_v42 = vpack.i.bf16 %v692_v10, %v691_v12  ;;  %v537_v34 = vmul.f32 %v529_v14, %v1705_v33  ;;  %v1377_v36 = vpop.permute.xlu2 %1376 }
  0xa9   : > { %v1450_v29 = vpack.i.bf16 %v888_v18, %v887_v19  ;;  %v1379_v41 = vunpack.i.h.bf16 %v1377_v36  ;;  %v1378_v45 = vunpack.i.l.bf16 %v1377_v36 }
  0xaa   : > { %1461 = vrot.lane.b32.xlu1 %v1460_v38, %s1574_s7 }
  0xb0   : > { %1431 = vrot.lane.b32.xlu0 %v1430_v55, %s1569_s27  ;;  %473 = vrot.lane.b32.xlu2 %v467_v57, %s1569_s27 }
  0xb2   : > { %1476 = vrot.lane.b32.xlu1 %v1475_v60, %s1569_s27  ;;  %v713_v60 = vmul.f32 %v1682_v22, %v529_v14 }
  0xb4   : > { %v1510_v63 = vpack.i.bf16 %v713_v60, %v712_v61 }
  0xb8   : > { %1446 = vrot.lane.b32.xlu0 %v1445_v3, %s1572_s30  ;;  %439 = vrot.lane.b32.xlu2 %v433_v49, %s1570_s28 }
  0xba   : > { %1491 = vrot.lane.b32.xlu1 %v1490_v5, %s1570_s28 }
  0xc0   : > { %1456 = vrot.lane.b32.xlu0 %v1455_v46, %s1568_s26  ;;  %1416 = vrot.lane.b32.xlu2 %v1415_v54, %s1569_s27  ;;  %v1865_v46 = vpop.permute.xlu1 %1361 }
  0xc1   : > { %v1364_v43 = vunpack.i.h.bf16 %v1865_v46 }
  0xc2   : > { %1496 = vrot.lane.b32.xlu1 %v1495_v47, %s1568_s26  ;;  %v648_v47 = vmul.f32 %v1686_v24, %v1741_v50  ;;  %v347_v50 = vmul.f32 %v1692_v27, %v1768_v1  ;;  %v536_v1 = vmul.f32 %v531_v39, %v1692_v27 }
  0xc4   : > { %v1440_v17 = vpack.i.bf16 %v824_v13, %v648_v47  ;;  %v1465_v55 = vpack.i.bf16 %v537_v34, %v536_v1  ;;  %v1363_v47 = vunpack.i.l.bf16 %v1865_v46 }
  0xc8   : > { %1471 = vrot.lane.b32.xlu0 %v1470_v35, %s1571_s29  ;;  %1426 = vrot.lane.b32.xlu2 %v1425_v48, %s1568_s26  ;;  %v765_v48 = vmul.f32 %v1694_v28, %v1758_v59  ;;  %v1889_v11 = vpop.permute.xlu1 %1366  ;;  %v744_v59 = vmul.f32 %v1694_v28, %v1776_v4  ;;  %v502_v4 = vmul.f32 %v1810_v26, %v1692_v27 }
  0xc9   : > { %v1369_v38 = vunpack.i.h.bf16 %v1889_v11 }
  0xca   : > { %1516 = vrot.lane.b32.xlu1 %v1515_v42, %s1574_s7  ;;  %v1500_v23 = vpack.i.bf16 %v347_v50, %v765_v48  ;;  %v1505_v53 = vpack.i.bf16 %v313_v6, %v744_v59  ;;  %v1480_v57 = vpack.i.bf16 %v1806_v20, %v502_v4 }
  0xcb   : > { %v1909_v28 = vsel %vm411_vm7, %v1379_v41, %v1369_v38 }
  0xd0   : > { %1486 = vrot.lane.b32.xlu0 %v1485_v15, %s1572_s30  ;;  %1441 = vrot.lane.b32.xlu2 %v1440_v17, %s1570_s28  ;;  %v1900_v37 = vpop.permute.xlu1 %1371  ;;  %v640_v17 = vsel %vm411_vm7, %v1363_v47, %v1364_v43 }
  0xd1   : > { %v1374_v52 = vunpack.i.h.bf16 %v1900_v37 }
  0xd2   : > { %717 = vrot.lane.b32.xlu1 %v711_v44, %s1573_s6 }
  0xd3   : > { %v1912_v33 = vsel %vm411_vm7, %v1374_v52, %v1378_v45 }
  0xd8   : > { %1501 = vrot.lane.b32.xlu0 %v1500_v23, %s1571_s29  ;;  %1451 = vrot.lane.b32.xlu2 %v1450_v29, %s1573_s6  ;;  %v406_v26 = vpop.permute.xlu1 %405  ;;  %v1974_v29 = vld [vmem:[%s2136_s2] ss:$8 sm:$0x3] }
  0xd9   : > { %v1930_v20 = vsel %vm411_vm7, %v406_v26, %v1374_v52  ;;  %v1981_v34 = vperm.slane %v1974_v29, 1  ;;  %v1368_v52 = vunpack.i.l.bf16 %v1889_v11 }
  0xdb   : > { %v639_v60 = vsel %vm411_vm7, %v1368_v52, %v1363_v47 }
  0xe0   : > { %1506 = vrot.lane.b32.xlu0 %v1505_v53, %s1572_s30  ;;  %1466 = vrot.lane.b32.xlu2 %v1465_v55, %s1573_s6  ;;  %v561_v55 = vmul.f32 %v1680_v21, %v1981_v34 }
  0xe8   : > { %386 = vrot.lane.b32.xlu0 %v380_v56, %s1568_s26  ;;  %1481 = vrot.lane.b32.xlu2 %v1480_v57, %s1574_s7  ;;  %s257_s26 = sadd.s32 %s1233_s25, %s1232_s17 }
  0xe9   : > { %s1234_s27 = sshll.u32 %s257_s26, 3 }
  0xeb   : > { %v1938_v0 = vpop.permute.xlu1 %1401 }
  0xf0   : > { %318 = vrot.lane.b32.xlu0 %v312_v62, %s1572_s30  ;;  %1511 = vrot.lane.b32.xlu2 %v1510_v63, %s1573_s6  ;;  %s259_s30 = scalar_lea.vmem %s2137_s3, %s1234_s27 }
  0xf8   : > { %352 = vrot.lane.b32.xlu2 %v346_v31, %s1571_s29 }
  0xfa   : > { %v1933_v22 = vpop.permute.xlu2 %1381 }
  0xfb   : > { %v1383_v62 = vunpack.i.l.bf16 %v1933_v22 }
 0x100   : > { %696 = vrot.lane.b32.xlu2 %v690_v2, %s1574_s7 }
 0x102   : > { %v1940_v3 = vpop.permute.xlu0 %1386  ;;  %v1942_v49 = vpop.permute.xlu2 %1391 }
 0x10a   : > { %v1944_v5 = vpop.permute.xlu0 %1396  ;;  %v1946_v58 = vpop.permute.xlu2 %473 }
 0x10b   : > { %v1948_v7 = vpop.permute.xlu1 %1406 }
 0x112   : > { %v1950_v8 = vpop.permute.xlu0 %1411  ;;  %v1952_v54 = vpop.permute.xlu2 %439 }
 0x113   : > { %v1954_v9 = vpop.permute.xlu1 %1436  ;;  %v1414_v11 = vunpack.i.h.bf16 %v1950_v8 }
 0x114   : > { %v1439_v48 = vunpack.i.h.bf16 %v1954_v9  ;;  %v1438_v50 = vunpack.i.l.bf16 %v1954_v9 }
 0x116   : > { %v601_v6 = vsel %vm358_vm11, %v1438_v50, %v1439_v48 }
 0x11a   : > { %v1422_v16 = vpop.permute.xlu0 %1421  ;;  %v1417_v51 = vpop.permute.xlu2 %1416 }
 0x11b   : > { %v1419_v10 = vunpack.i.h.bf16 %v1417_v51  ;;  %v1418_v12 = vunpack.i.l.bf16 %v1417_v51  ;;  %v1424_v35 = vunpack.i.h.bf16 %v1422_v16  ;;  %v1423_v42 = vunpack.i.l.bf16 %v1422_v16 }
 0x11c   : > { %v1956_v40 = vpop.permute.xlu1 %1461  ;;  %v1393_v51 = vunpack.i.l.bf16 %v1942_v49 }
 0x11d   : > { %v682_v13 = vsel %vm479_vm8, %v1418_v12, %v1419_v10  ;;  %v661_v14 = vsel %vm445_vm9, %v1423_v42, %v1424_v35  ;;  %v1464_v21 = vunpack.i.h.bf16 %v1956_v40  ;;  %v1463_v31 = vunpack.i.l.bf16 %v1956_v40 }
 0x11e   : > { %1004 = vmatpush.msra.mxu2 %v682_v13  ;;  %v1389_v40 = vunpack.i.h.bf16 %v1940_v3 }
 0x120   : > { %1005 = vmatpush.msra.mxu2 %v661_v14  ;;  %v877_v14 = vsel %vm513_vm14, %v1393_v51, %v1463_v31 }
 0x122   : > { %v1962_v15 = vpop.permute.xlu0 %1431  ;;  %v1427_v39 = vpop.permute.xlu2 %1426  ;;  %1006 = vmatpush.msra.mxu2 %v640_v17  ;;  %v878_v17 = vsel %vm513_vm14, %v1463_v31, %v1464_v21 }
 0x123   : > { %v1433_v44 = vunpack.i.l.bf16 %v1962_v15  ;;  %v1429_v46 = vunpack.i.h.bf16 %v1427_v39  ;;  %v1428_v18 = vunpack.i.l.bf16 %v1427_v39 }
 0x124   : > { %v1968_v19 = vpop.permute.xlu1 %1476 }
 0x125   : > { %v681_v23 = vsel %vm479_vm8, %v1433_v44, %v1418_v12  ;;  %v622_v59 = vsel %vm392_vm10, %v1428_v18, %v1429_v46  ;;  %v1434_v12 = vunpack.i.h.bf16 %v1962_v15  ;;  %v1478_v35 = vunpack.i.l.bf16 %v1968_v19 }
 0x126   : > { %964 = vmatpush.msra.mxu0 %v681_v23  ;;  %1007 = vmatpush.msra.mxu2 %v622_v59  ;;  %v1399_v15 = vunpack.i.h.bf16 %v1944_v5 }
 0x127   : > { %v856_v48 = vsel %vm479_vm8, %v1389_v40, %v1434_v12  ;;  %v857_v46 = vsel %vm479_vm8, %v1434_v12, %v1478_v35  ;;  %v1384_v40 = vunpack.i.h.bf16 %v1933_v22 }
 0x128   : > { %1008 = vmatpush.msra.mxu2 %v601_v6 }
 0x12a   : > { %v1983_v1 = vpop.permute.xlu0 %1446  ;;  %v1442_v36 = vpop.permute.xlu2 %1441 }
 0x12b   : > { %v1449_v41 = vunpack.i.h.bf16 %v1983_v1  ;;  %v1448_v45 = vunpack.i.l.bf16 %v1983_v1  ;;  %v1443_v53 = vunpack.i.l.bf16 %v1442_v36  ;;  %v1444_v47 = vunpack.i.h.bf16 %v1442_v36 }
 0x12c   : > { %v1994_v57 = vpop.permute.xlu1 %1491  ;;  %v1394_v1 = vunpack.i.h.bf16 %v1942_v49 }
 0x12d   : > { %v580_v4 = vsel %vm324_vm12, %v1448_v45, %v1449_v41  ;;  %v660_v56 = vsel %vm445_vm9, %v1443_v53, %v1423_v42  ;;  %v1493_v13 = vunpack.i.l.bf16 %v1994_v57  ;;  %v835_v6 = vsel %vm445_vm9, %v1399_v15, %v1444_v47 }
 0x12e   : > { %1009 = vmatpush.msra.mxu2 %v580_v4  ;;  %965 = vmatpush.msra.mxu0 %v660_v56  ;;  %v1404_v4 = vunpack.i.h.bf16 %v1938_v0 }
 0x12f   : > { %v836_v53 = vsel %vm445_vm9, %v1444_v47, %v1493_v13 }
 0x130   : > { %1010 = vmatpush.msra.mxu2 %v561_v55  ;;  %966 = vmatpush.msra.mxu0 %v639_v60 }
 0x132   : > { %v1457_v61 = vpop.permute.xlu0 %1456  ;;  %v1452_v63 = vpop.permute.xlu2 %1451 }
 0x133   : > { %v1458_v26 = vunpack.i.l.bf16 %v1457_v61  ;;  %v1454_v2 = vunpack.i.h.bf16 %v1452_v63  ;;  %v1453_v16 = vunpack.i.l.bf16 %v1452_v63  ;;  %v1459_v36 = vunpack.i.h.bf16 %v1457_v61 }
 0x134   : > { %v2011_v39 = vpop.permute.xlu1 %1496 }
 0x135   : > { %v621_v10 = vsel %vm392_vm10, %v1458_v26, %v1428_v18  ;;  %v898_v42 = vsel %vm547_vm13, %v1383_v62, %v1453_v16  ;;  %v899_v43 = vsel %vm547_vm13, %v1453_v16, %v1454_v2  ;;  %v1373_v18 = vunpack.i.l.bf16 %v1900_v37 }
 0x136   : > { %967 = vmatpush.msra.mxu0 %v621_v10  ;;  %989 = vmatpush.msra.mxu1 %v898_v42  ;;  %v1498_v55 = vunpack.i.l.bf16 %v2011_v39  ;;  %v1409_v62 = vunpack.i.h.bf16 %v1948_v7  ;;  %v796_v9 = vsel %vm392_vm10, %v1404_v4, %v1459_v36  ;;  %v1388_v42 = vunpack.i.l.bf16 %v1940_v3 }
 0x137   : > { %1029 = vmatpush.msra.mxu3 %v899_v43  ;;  %v815_v61 = vsel %vm411_vm7, %v1369_v38, %v1373_v18  ;;  %v1479_v38 = vunpack.i.h.bf16 %v1968_v19  ;;  %v1494_v43 = vunpack.i.h.bf16 %v1994_v57 }
 0x138   : > { %990 = vmatpush.msra.mxu1 %v877_v14  ;;  %v797_v63 = vsel %vm392_vm10, %v1459_v36, %v1498_v55 }
 0x139   : > { %1030 = vmatpush.msra.mxu3 %v878_v17  ;;  %v1403_v17 = vunpack.i.l.bf16 %v1938_v0  ;;  %v446_v0 = vsel %vm445_vm9, %v1952_v54, %v1494_v43 }
 0x13a   : > { %v2013_v44 = vpop.permute.xlu0 %1471  ;;  %v1467_v23 = vpop.permute.xlu2 %1466  ;;  %991 = vmatpush.msra.mxu1 %v856_v48 }
 0x13b   : > { %v1473_v59 = vunpack.i.l.bf16 %v2013_v44  ;;  %1031 = vmatpush.msra.mxu3 %v857_v46  ;;  %v1469_v41 = vunpack.i.h.bf16 %v1467_v23  ;;  %v1468_v52 = vunpack.i.l.bf16 %v1467_v23  ;;  %v1474_v56 = vunpack.i.h.bf16 %v2013_v44 }
 0x13c   : > { %992 = vmatpush.msra.mxu1 %v835_v6  ;;  %v2043_v21 = vpop.permute.xlu1 %1516  ;;  %v1408_v46 = vunpack.i.l.bf16 %v1948_v7  ;;  %v1413_v7 = vunpack.i.l.bf16 %v1950_v8 }
 0x13d   : > { %1032 = vmatpush.msra.mxu3 %v836_v53  ;;  %v600_v37 = vsel %vm358_vm11, %v1473_v59, %v1438_v50  ;;  %v549_v60 = vsel %vm547_vm13, %v1468_v52, %v1469_v41  ;;  %v2035_v50 = vperm.slane %v1974_v29, 0  ;;  %v548_v3 = vsel %vm547_vm13, %v1384_v40, %v1468_v52 }
 0x13e   : > { %968 = vmatpush.msra.mxu0 %v600_v37  ;;  %993 = vmatpush.msra.mxu1 %v1909_v28  ;;  %v775_v28 = vsel %vm358_vm11, %v1409_v62, %v1474_v56  ;;  %v736_v41 = vmul.f32 %v1688_v25, %v1981_v34  ;;  %v294_v52 = vmul.f32 %v1692_v27, %v1981_v34  ;;  %v1519_v8 = vunpack.i.h.bf16 %v2043_v21  ;;  %v905_v34 = vld [vmem:[%s2135_s1 + $0x8] sm:$0xff] }
 0x13f   : > { %1011 = vmatpush.msra.mxu2 %v549_v60  ;;  %1033 = vmatpush.msra.mxu3 %v815_v61  ;;  %v560_v10 = vmul.f32 %v1686_v24, %v2035_v50  ;;  %v735_v12 = vmul.f32 %v1703_v32, %v2035_v50  ;;  %v1398_v24 = vunpack.i.l.bf16 %v1944_v5  ;;  %v481_v32 = vsel %vm479_vm8, %v1479_v38, %v1388_v42 }
 0x140   : > { %994 = vmatpush.msra.mxu1 %v796_v9  ;;  %v1518_v37 = vunpack.i.l.bf16 %v2043_v21 }
 0x141   : > { %1034 = vmatpush.msra.mxu3 %v797_v63  ;;  %v447_v13 = vsel %vm445_vm9, %v1494_v43, %v1398_v24  ;;  %v293_v63 = vmul.f32 %v1698_v30, %v2035_v50 }
 0x142   : > { %v2038_v26 = vpop.permute.xlu0 %1486  ;;  %v1482_v31 = vpop.permute.xlu2 %1481  ;;  %995 = vmatpush.msra.mxu1 %v775_v28  ;;  %v703_v60 = vsel %vm513_vm14, %v1518_v37, %v1519_v8 }
 0x143   : > { %v1489_v2 = vunpack.i.h.bf16 %v2038_v26  ;;  %v1488_v29 = vunpack.i.l.bf16 %v2038_v26  ;;  %v1484_v16 = vunpack.i.h.bf16 %v1482_v31  ;;  %v1483_v51 = vunpack.i.l.bf16 %v1482_v31 }
 0x144   : > { %v718_v49 = vpop.permute.xlu1 %717 }
 0x145   : > { %v579_v19 = vsel %vm324_vm12, %v1488_v29, %v1448_v45  ;;  %v754_v35 = vsel %vm324_vm12, %v1414_v11, %v1489_v2  ;;  %v515_v47 = vsel %vm513_vm14, %v1483_v51, %v1484_v16  ;;  %v1499_v45 = vunpack.i.h.bf16 %v2011_v39 }
 0x146   : > { %969 = vmatpush.msra.mxu0 %v579_v19  ;;  %996 = vmatpush.msra.mxu1 %v754_v35  ;;  %v514_v5 = vsel %vm513_vm14, %v1394_v1, %v1483_v51  ;;  %v480_v39 = vsel %vm479_vm8, %v1946_v58, %v1479_v38 }
 0x147   : > { %1012 = vmatpush.msra.mxu2 %v515_v47  ;;  %v394_v23 = vsel %vm392_vm10, %v1499_v45, %v1403_v17 }
 0x148   : > { %970 = vmatpush.msra.mxu0 %v560_v10  ;;  %997 = vmatpush.msra.mxu1 %v735_v12 }
 0x149   : > { %1013 = vmatpush.msra.mxu2 %v481_v32 }
 0x14a   : > { %v1502_v57 = vpop.permute.xlu0 %1501  ;;  %971 = vmatpush.msra.mxu0 %v548_v3  ;;  %v1512_v14 = vpop.permute.xlu2 %1511 }
 0x14b   : > { %v1503_v22 = vunpack.i.l.bf16 %v1502_v57  ;;  %1014 = vmatpush.msra.mxu2 %v447_v13  ;;  %v1513_v15 = vunpack.i.l.bf16 %v1512_v14  ;;  %v1504_v44 = vunpack.i.h.bf16 %v1502_v57  ;;  %v1514_v53 = vunpack.i.h.bf16 %v1512_v14 }
 0x14c   : > { %972 = vmatpush.msra.mxu0 %v514_v5 }
 0x14d   : > { %1015 = vmatpush.msra.mxu2 %v1912_v33  ;;  %v776_v48 = vsel %vm358_vm11, %v1474_v56, %v1503_v22  ;;  %v723_v18 = vsel %vm547_vm13, %v718_v49, %v1513_v15  ;;  %v360_v33 = vsel %vm358_vm11, %v1504_v44, %v1408_v46  ;;  %v724_v25 = vsel %vm547_vm13, %v1513_v15, %v1514_v53 }
 0x14e   : > { %973 = vmatpush.msra.mxu0 %v480_v39  ;;  %1035 = vmatpush.msra.mxu3 %v776_v48 }
 0x14f   : > { %998 = vmatpush.msra.mxu1 %v723_v18  ;;  %1016 = vmatpush.msra.mxu2 %v394_v23 }
 0x150   : > { %974 = vmatpush.msra.mxu0 %v446_v0 }
 0x151   : > { %1017 = vmatpush.msra.mxu2 %v360_v33 }
 0x152   : > { %975 = vmatpush.msra.mxu0 %v1930_v20  ;;  %v1507_v58 = vpop.permute.xlu0 %1506  ;;  %v353_v59 = vpop.permute.xlu2 %352  ;;  %v904_v20 = vld [vmem:[%s2135_s1] sm:$0xff] }
 0x153   : > { %v1509_v6 = vunpack.i.h.bf16 %v1507_v58  ;;  %v1508_v36 = vunpack.i.l.bf16 %v1507_v58  ;;  %v359_v62 = vsel %vm358_vm11, %v353_v59, %v1504_v44 }
 0x155   : > { %v326_v54 = vsel %vm324_vm12, %v1509_v6, %v1413_v7  ;;  %v755_v55 = vsel %vm324_vm12, %v1489_v2, %v1508_v36 }
 0x156   : > { %1018 = vmatpush.msra.mxu2 %v326_v54  ;;  %1036 = vmatpush.msra.mxu3 %v755_v55 }
 0x158   : > { %1037 = vmatpush.msra.mxu3 %v736_v41  ;;  %1019 = vmatpush.msra.mxu2 %v294_v52 }
 0x159   : > { %1020 = vmatmul.f32.vlgmr.msra.gmra.mxu2 %v904_v20 }
 0x15a   : > { %v387_v27 = vpop.permute.xlu0 %386  ;;  %1038 = vmatpush.msra.mxu3 %v724_v25  ;;  %v697_v4 = vpop.permute.xlu2 %696 }
 0x15b   : > { %v393_v56 = vsel %vm392_vm10, %v387_v27, %v1499_v45  ;;  %v702_v61 = vsel %vm513_vm14, %v697_v4, %v1518_v37 }
 0x15c   : > { %976 = vmatpush.msra.mxu0 %v393_v56  ;;  %1039 = vmatpush.msra.mxu3 %v703_v60 }
 0x15d   : > { %999 = vmatpush.msra.mxu1 %v702_v61  ;;  %1298 = vmatmul.msk.f32.vlgmr.msra.gmra.mxu3 %vm960_vm15, %v905_v34 }
 0x15e   : > { %977 = vmatpush.msra.mxu0 %v359_v62  ;;  %1297 = vmatmul.msk.f32.vlgmr.msra.gmra.mxu1 %vm960_vm15, %v905_v34 }
 0x162   : > { %v319_v9 = vpop.permute.xlu0 %318 }
 0x163   : > { %v325_v26 = vsel %vm324_vm12, %v319_v9, %v1509_v6 }
 0x164   : > { %978 = vmatpush.msra.mxu0 %v325_v26 }
 0x166   : > { %979 = vmatpush.msra.mxu0 %v293_v63 }
 0x167   : > { %980 = vmatmul.f32.vlgmr.msra.gmra.mxu0 %v904_v20 }
 0x1db   : > { %v1001_v21 = vpop.f32.mrf.mxu1 }
 0x1dc   : > { %v1021_v28 = vpop.f32.mrf.mxu2 }
 0x1e0   : > { %v1041_v11 = vpop.f32.mrf.mxu3 }
 0x1e1   : > { %v1042_v38 = vadd.f32 %v1041_v11, %v1021_v28 }
 0x1e3   : > { %1045 = vst [vmem:[%s259_s30 + $0x8] sm:$0xff] %v1042_v38  ;;  %v1050_v31 = vmul.f32 %v1042_v38, %v1042_v38 }
 0x1e4   : > { %v981_v30 = vpop.f32.mrf.mxu0 }
 0x1e5   : > { %v1002_v50 = vadd.f32 %v1001_v21, %v981_v30 }
 0x1e7   : > { %1044 = vst [vmem:[%s259_s30] sm:$0xff] %v1002_v50  ;;  %v1046_v2 = vadd.f32 %v1042_v38, %v1002_v50  ;;  %v1049_v29 = vmul.f32 %v1002_v50, %v1002_v50 }
 0x1e9   : > { %1047 = vadd.xlane.f32.xlu0 %v1046_v2  ;;  %v1051_v16 = vadd.f32 %v1050_v31, %v1049_v29 }
 0x1eb   : > { %1052 = vadd.xlane.f32.xlu1 %v1051_v16 }
 0x25a   : > { %1057 = sbr.rel (%p1299_p7) target bundleno = 609 (0x261), region = 36 }
 0x25c   : > { %v1048_v51 = vpop.xlane.xlu0 %1047 }
 0x25e   : > { %v1053_v10 = vpop.xlane.xlu1 %1052 }
 0x25f   : > { %1058 = vst.msk [vmem:[%s1656_s12] sm:$0xff] %vm307_vm5, %v1048_v51 }
 0x260   : > { %1059 = vst.msk [vmem:[%s1661_s15] sm:$0xff] %vm307_vm5, %v1053_v10 }
 0x261 PF: > { %p1300_p8 = scmp.le.s32.totalorder %s1542_s18, 0 }
 0x263   : > { %1063 = sbr.rel (%p1300_p8) target bundleno = 621 (0x26d), region = 40 }
 0x268   : > { %v1064_v12 = vld [vmem:[%s1656_s12] sm:$0xff] }
 0x269   : > { %v1067_v19 = vld [vmem:[%s1661_s15] sm:$0xff]  ;;  %v1065_v35 = vadd.f32 %v1064_v12, %v1048_v51 }
 0x26a   : > { %v1068_v42 = vadd.f32 %v1067_v19, %v1053_v10 }
 0x26b   : > { %1066 = vst.msk [vmem:[%s1656_s12] sm:$0xff] %vm307_vm5, %v1065_v35 }
 0x26c   : > { %1069 = vst.msk [vmem:[%s1661_s15] sm:$0xff] %vm307_vm5, %v1068_v42 }
 0x26d PF: > { %s16_s22 = sadd.s32 1, %s1558_s22   ;;  %s2140_s18 = smov %s1550_s20 }
 0x26e   : > { %p13_p9 = scmp.ge.s32.totalorder %s16_s22, 18   ;;  %s2141_s19 = smov %s1554_s21 }
 0x26f   : > { %s2142_s20 = smov %s2145_s23  ;;  %s2143_s21 = smov %s2149_s24 }
 0x270   :  { %15 = sbr.rel (!%p13_p9) target bundleno = 3 (0x3), region = 104 }

</bundles_post_ra>
